<compile_context>
chip_gen: v6e
topology: v6e:2x2x1
jax: 0.10.0
libtpu: 0.0.40
codegen_flags: <defaults>
</compile_context>

<pallas_src>
from functools import partial

import jax
import jax.numpy as jnp
from jax import lax
from jax.experimental import pallas as pl
from jax.experimental.pallas import tpu as pltpu


# ----------------------------------------------------------------------------
# Fused kernel: `batch_block` batch elements folded into the row dimension.
# ----------------------------------------------------------------------------
def _fused_attention_kernel(x_ref, wq_ref, wk_ref, wv_ref, wp_ref, bp_ref,
                            o_ref, *, batch_block, seq_len, L_mt, num_heads,
                            head_dim):
    M, C = x_ref.shape            # M = batch_block * seq_len

    # ---- q / k / v projections: 3 batch-folded matmuls (scale folded in wq)
    x_bf = x_ref[...].astype(jnp.bfloat16)
    q = jnp.dot(x_bf, wq_ref[...], preferred_element_type=jnp.float32)
    k = jnp.dot(x_bf, wk_ref[...], preferred_element_type=jnp.float32)
    v = jnp.dot(x_bf, wv_ref[...], preferred_element_type=jnp.float32)
    k_bf = k.astype(jnp.bfloat16)
    v_bf = v.astype(jnp.bfloat16)

    # ---- static masks, built once with iota (VPU work, off the MXU path) ---
    row = lax.broadcasted_iota(jnp.int32, (M, M), 0)
    col = lax.broadcasted_iota(jnp.int32, (M, M), 1)
    allowed = row < 0                                   # all-False
    for b in range(batch_block):                        # static unroll (<= B)
        r0 = b * seq_len
        in_row = (row >= r0) & (row < r0 + seq_len)
        in_col = (col >= r0) & (col < r0 + seq_len)
        # Search rows see every key of their own batch; template/memory rows
        # only see the template keys of their own batch.
        allowed = allowed | (in_row & in_col &
                             ((row >= r0 + L_mt) | (col < r0 + L_mt)))
    neg_mask = jnp.where(allowed, 0.0, -1e30).astype(jnp.float32)

    lane = lax.broadcasted_iota(jnp.int32, (M, C), 1)

    # ---- per-head attention: exactly 1 score + 1 PV matmul per head --------
    dn = (((1,), (1,)), ((), ()))                       # contract last dims (no k.T)
    concat = jnp.zeros((M, C), jnp.float32)
    for h in range(num_heads):                          # static unroll
        lo = h * head_dim
        head_sel = (lane >= lo) & (lane < lo + head_dim)
        # Lane-mask q (VPU select in f32, then cast) instead of extracting an
        # 8-lane slice at a non-zero lane offset (XLU rotate) before the MXU.
        q_h = jnp.where(head_sel, q, 0.0).astype(jnp.bfloat16)
        s = lax.dot_general(q_h, k_bf, dn, preferred_element_type=jnp.float32)
        s = s + neg_mask                                # mask BEFORE max / exp
        s = s - jnp.max(s, axis=-1, keepdims=True)
        p = jnp.exp(s)
        p = p / jnp.sum(p, axis=-1, keepdims=True)      # exact divide (accuracy)
        # Full-width PV (extra lanes are free inside one MXU pass); keep only
        # this head's lanes when striping into the concat buffer.
        o_wide = jnp.dot(p.astype(jnp.bfloat16), v_bf,
                         preferred_element_type=jnp.float32)       # (M, C)
        concat = jnp.where(head_sel, o_wide, concat)

    # ---- single fused output projection + bias, one lane-dense slab store --
    out = jnp.dot(concat.astype(jnp.bfloat16), wp_ref[...],
                  preferred_element_type=jnp.float32) + bp_ref[...]
    o_ref[...] = out


# ----------------------------------------------------------------------------
# One-time weight preparation (outside the hot path)
# ----------------------------------------------------------------------------
def prepare_attention_params(w_qkv, w_proj, b_proj, num_heads):
    """Split / scale / cast the weights once.

    Expected layout: w_qkv is (C, 3C) with columns [q(head0..headH-1) | k | v],
    i.e. the TRANSPOSE of torch nn.Linear(dim, 3*dim).weight.  The softmax
    scale head_dim**-0.5 is folded into w_q; matmul weights are cast to bf16
    (the kernel accumulates in f32).
    """
    C = w_qkv.shape[0]
    assert w_qkv.shape == (C, 3 * C), "w_qkv must be (C, 3C), columns [q|k|v] x [head]"
    assert w_proj.shape == (C, C) and b_proj.shape == (C,)
    assert C % num_heads == 0
    scale = (C // num_heads) ** (-0.5)
    w_q = (w_qkv[:, :C] * scale).astype(jnp.bfloat16)
    w_k = w_qkv[:, C:2 * C].astype(jnp.bfloat16)
    w_v = w_qkv[:, 2 * C:].astype(jnp.bfloat16)
    return w_q, w_k, w_v, w_proj.astype(jnp.bfloat16), b_proj.reshape(1, C)


def _default_batch_block(B):
    """How many batch elements to fold into one grid step.

    v7x has 2 TensorCores per chip -> keep a >=2-way "parallel" batch grid so
    both cores get work.  v5e/v6e have one TensorCore, so the grid is just a
    serial loop: fold the whole (tiny) batch into a single step and avoid the
    per-step overhead.
    """
    try:
        kind = jax.devices()[0].device_kind.lower()
    except Exception:
        kind = ""
    if "v7" in kind and B > 1:
        return 1
    return B


# ----------------------------------------------------------------------------
# Forward pass (matches Attention.forward with dropout in eval mode)
# ----------------------------------------------------------------------------
def attention_forward(x, w_q, w_k, w_v, w_proj, b_proj, *, num_heads,
                      t_h, t_w, s_h, s_w, batch_block=None):
    B, N, C = x.shape
    hd = C // num_heads
    L_mt = t_h * t_w * 2
    assert N == L_mt + s_h * s_w
    # Row blocks of the (B*N, C) view must be sublane aligned.
    assert N % 8 == 0, "N must be a multiple of 8"

    bb = _default_batch_block(B) if batch_block is None else batch_block
    assert B % bb == 0
    M = bb * N
    steps = B // bb

    flops_step = 4 * (2 * M * C * C) + num_heads * (4 * M * M * C)
    cost = pl.CostEstimate(
        flops=steps * flops_step,
        transcendentals=steps * num_heads * M * M,
        bytes_accessed=2 * 4 * B * N * C + 2 * (4 * C * C) + 4 * C,
    )

    kernel = partial(_fused_attention_kernel, batch_block=bb, seq_len=N,
                     L_mt=L_mt, num_heads=num_heads, head_dim=hd)

    out = pl.pallas_call(
        kernel,
        out_shape=jax.ShapeDtypeStruct((B * N, C), jnp.float32),
        grid=(steps,),
        in_specs=[
            pl.BlockSpec((M, C), lambda b: (b, 0)),       # x rows (bb batches/step)
            pl.BlockSpec((C, C), lambda b: (0, 0)),       # w_q  (VMEM-resident)
            pl.BlockSpec((C, C), lambda b: (0, 0)),       # w_k
            pl.BlockSpec((C, C), lambda b: (0, 0)),       # w_v
            pl.BlockSpec((C, C), lambda b: (0, 0)),       # w_proj
            pl.BlockSpec((1, C), lambda b: (0, 0)),       # b_proj
        ],
        out_specs=pl.BlockSpec((M, C), lambda b: (b, 0)),
        compiler_params=pltpu.CompilerParams(
            dimension_semantics=("parallel",)),
        cost_estimate=cost,
    )(x.reshape(B * N, C), w_q, w_k, w_v, w_proj, b_proj)
    return out.reshape(B, N, C)


# ----------------------------------------------------------------------------
# Pure-JAX reference (mirrors the PyTorch code line-by-line, eval mode)
# ----------------------------------------------------------------------------
def attention_reference(x, w_qkv, w_proj, b_proj, num_heads, t_h, t_w, s_h, s_w):
    B, N, C = x.shape
    hd = C // num_heads
    scale = hd ** (-0.5)
    L_mt = t_h * t_w * 2

    qkv = (x.reshape(B * N, C) @ w_qkv).reshape(B, N, 3, num_heads, hd)
    qkv = qkv.transpose(2, 0, 3, 1, 4)
    q, k, v = qkv[0], qkv[1], qkv[2]
    q_mt, q_s = q[:, :, :L_mt], q[:, :, L_mt:]
    k_mt = k[:, :, :L_mt]
    v_mt = v[:, :, :L_mt]

    attn = jax.nn.softmax(q_mt @ jnp.swapaxes(k_mt, -2, -1) * scale, axis=-1)
    x_mt = (attn @ v_mt).transpose(0, 2, 1, 3).reshape(B, L_mt, C)

    attn = jax.nn.softmax(q_s @ jnp.swapaxes(k, -2, -1) * scale, axis=-1)
    x_s = (attn @ v).transpose(0, 2, 1, 3).reshape(B, N - L_mt, C)

    xo = jnp.concatenate([x_mt, x_s], axis=1)
    return (xo.reshape(B * N, C) @ w_proj + b_proj[None, :]).reshape(B, N, C)


if __name__ == "__main__":
    B = 2
    dim = 32
    num_heads = 4
    t_h = t_w = 2      # template: t_h*t_w*2 = 8 tokens
    s_h = s_w = 4      # search:   s_h*s_w   = 16 tokens
    N = t_h * t_w * 2 + s_h * s_w  # 24

    key = jax.random.PRNGKey(0)
    kx, kw1, kw2, kb2 = jax.random.split(key, 4)
    x = jax.random.normal(kx, (B, N, dim), jnp.float32)
    w_qkv = jax.random.normal(kw1, (dim, 3 * dim), jnp.float32) * 0.1   # qkv_bias=False
    w_proj = jax.random.normal(kw2, (dim, dim), jnp.float32) * 0.1
    b_proj = jax.random.normal(kb2, (dim,), jnp.float32) * 0.1

    # One-time weight transform (layout split, scale fold, bf16 cast).
    params = prepare_attention_params(w_qkv, w_proj, b_proj, num_heads)

    out = attention_forward(x, *params, num_heads=num_heads,
                            t_h=t_h, t_w=t_w, s_h=s_h, s_w=s_w)
    jax.block_until_ready(out)

    ref = attention_reference(x, w_qkv, w_proj, b_proj, num_heads, t_h, t_w, s_h, s_w)
    assert out.shape == (B, N, dim)
    # bf16 MXU operands (f32 accumulation) vs an all-f32 reference.
    assert jnp.allclose(out, ref, atol=2e-2, rtol=2e-2), "mismatch vs reference"
    print("KERNEL_OK")
</pallas_src>

<mosaic_0001>
module attributes {stable_mosaic.version = 11 : i64} {
  func.func @_fused_attention_kernel(%arg0: i32, %arg1: memref<48x32xf32, #tpu.memory_space<vmem>>, %arg2: memref<32x32xbf16, #tpu.memory_space<vmem>>, %arg3: memref<32x32xbf16, #tpu.memory_space<vmem>>, %arg4: memref<32x32xbf16, #tpu.memory_space<vmem>>, %arg5: memref<32x32xbf16, #tpu.memory_space<vmem>>, %arg6: memref<1x32xf32, #tpu.memory_space<vmem>>, %arg7: memref<48x32xf32, #tpu.memory_space<vmem>>) attributes {dimension_semantics = [#tpu.dimension_semantics<parallel>], iteration_bounds = array<i64: 1>, scalar_prefetch = 0 : i64, scratch_operands = 0 : i64, tpu.core_type = #tpu.core_type<tc>, window_params = [{transform_indices = @transform_0, window_bounds = array<i64: 48, 32>}, {pipeline_mode = #tpu.pipeline_mode<synchronous>, transform_indices = @transform_1, window_bounds = array<i64: 32, 32>}, {pipeline_mode = #tpu.pipeline_mode<synchronous>, transform_indices = @transform_2, window_bounds = array<i64: 32, 32>}, {pipeline_mode = #tpu.pipeline_mode<synchronous>, transform_indices = @transform_3, window_bounds = array<i64: 32, 32>}, {pipeline_mode = #tpu.pipeline_mode<synchronous>, transform_indices = @transform_4, window_bounds = array<i64: 32, 32>}, {pipeline_mode = #tpu.pipeline_mode<synchronous>, transform_indices = @transform_5, window_bounds = array<i64: 1, 32>}, {transform_indices = @transform_6, window_bounds = array<i64: 48, 32>}]} {
    %c0 = arith.constant 0 : index
    %c0_0 = arith.constant 0 : index
    %0 = vector.load %arg1[%c0, %c0_0] : memref<48x32xf32, #tpu.memory_space<vmem>>, vector<48x32xf32>
    %1 = arith.truncf %0 : vector<48x32xf32> to vector<48x32xbf16>
    %c0_1 = arith.constant 0 : index
    %c0_2 = arith.constant 0 : index
    %2 = vector.load %arg2[%c0_1, %c0_2] : memref<32x32xbf16, #tpu.memory_space<vmem>>, vector<32x32xbf16>
    %cst = arith.constant dense<0.000000e+00> : vector<48x32xf32>
    %3 = tpu.matmul %1, %2, %cst {dimension_numbers = #tpu.dot_dimension_numbers<[1], [0], [0], [1], [0, 0, 1, 1], [], []>} : vector<48x32xbf16>, vector<32x32xbf16>, vector<48x32xf32> -> vector<48x32xf32>
    %c0_3 = arith.constant 0 : index
    %c0_4 = arith.constant 0 : index
    %4 = vector.load %arg3[%c0_3, %c0_4] : memref<32x32xbf16, #tpu.memory_space<vmem>>, vector<32x32xbf16>
    %cst_5 = arith.constant dense<0.000000e+00> : vector<48x32xf32>
    %5 = tpu.matmul %1, %4, %cst_5 {dimension_numbers = #tpu.dot_dimension_numbers<[1], [0], [0], [1], [0, 0, 1, 1], [], []>} : vector<48x32xbf16>, vector<32x32xbf16>, vector<48x32xf32> -> vector<48x32xf32>
    %c0_6 = arith.constant 0 : index
    %c0_7 = arith.constant 0 : index
    %6 = vector.load %arg4[%c0_6, %c0_7] : memref<32x32xbf16, #tpu.memory_space<vmem>>, vector<32x32xbf16>
    %cst_8 = arith.constant dense<0.000000e+00> : vector<48x32xf32>
    %7 = tpu.matmul %1, %6, %cst_8 {dimension_numbers = #tpu.dot_dimension_numbers<[1], [0], [0], [1], [0, 0, 1, 1], [], []>} : vector<48x32xbf16>, vector<32x32xbf16>, vector<48x32xf32> -> vector<48x32xf32>
    %8 = arith.truncf %5 : vector<48x32xf32> to vector<48x32xbf16>
    %9 = arith.truncf %7 : vector<48x32xf32> to vector<48x32xbf16>
    %10 = tpu.iota {dimensions = array<i32: 0>} : vector<48x48xi32>
    %11 = tpu.iota {dimensions = array<i32: 1>} : vector<48x48xi32>
    %c0_i32 = arith.constant 0 : i32
    %12 = vector.broadcast %c0_i32 : i32 to vector<48x48xi32>
    %13 = arith.cmpi slt, %10, %12 : vector<48x48xi32>
    %c0_i32_9 = arith.constant 0 : i32
    %14 = vector.broadcast %c0_i32_9 : i32 to vector<48x48xi32>
    %15 = arith.cmpi sge, %10, %14 : vector<48x48xi32>
    %c24_i32 = arith.constant 24 : i32
    %16 = vector.broadcast %c24_i32 : i32 to vector<48x48xi32>
    %17 = arith.cmpi slt, %10, %16 : vector<48x48xi32>
    %18 = arith.andi %15, %17 : vector<48x48xi1>
    %c0_i32_10 = arith.constant 0 : i32
    %19 = vector.broadcast %c0_i32_10 : i32 to vector<48x48xi32>
    %20 = arith.cmpi sge, %11, %19 : vector<48x48xi32>
    %c24_i32_11 = arith.constant 24 : i32
    %21 = vector.broadcast %c24_i32_11 : i32 to vector<48x48xi32>
    %22 = arith.cmpi slt, %11, %21 : vector<48x48xi32>
    %23 = arith.andi %20, %22 : vector<48x48xi1>
    %24 = arith.andi %18, %23 : vector<48x48xi1>
    %c8_i32 = arith.constant 8 : i32
    %25 = vector.broadcast %c8_i32 : i32 to vector<48x48xi32>
    %26 = arith.cmpi sge, %10, %25 : vector<48x48xi32>
    %c8_i32_12 = arith.constant 8 : i32
    %27 = vector.broadcast %c8_i32_12 : i32 to vector<48x48xi32>
    %28 = arith.cmpi slt, %11, %27 : vector<48x48xi32>
    %29 = arith.ori %26, %28 : vector<48x48xi1>
    %30 = arith.andi %24, %29 : vector<48x48xi1>
    %31 = arith.ori %13, %30 : vector<48x48xi1>
    %c24_i32_13 = arith.constant 24 : i32
    %32 = vector.broadcast %c24_i32_13 : i32 to vector<48x48xi32>
    %33 = arith.cmpi sge, %10, %32 : vector<48x48xi32>
    %c48_i32 = arith.constant 48 : i32
    %34 = vector.broadcast %c48_i32 : i32 to vector<48x48xi32>
    %35 = arith.cmpi slt, %10, %34 : vector<48x48xi32>
    %36 = arith.andi %33, %35 : vector<48x48xi1>
    %c24_i32_14 = arith.constant 24 : i32
    %37 = vector.broadcast %c24_i32_14 : i32 to vector<48x48xi32>
    %38 = arith.cmpi sge, %11, %37 : vector<48x48xi32>
    %c48_i32_15 = arith.constant 48 : i32
    %39 = vector.broadcast %c48_i32_15 : i32 to vector<48x48xi32>
    %40 = arith.cmpi slt, %11, %39 : vector<48x48xi32>
    %41 = arith.andi %38, %40 : vector<48x48xi1>
    %42 = arith.andi %36, %41 : vector<48x48xi1>
    %c32_i32 = arith.constant 32 : i32
    %43 = vector.broadcast %c32_i32 : i32 to vector<48x48xi32>
    %44 = arith.cmpi sge, %10, %43 : vector<48x48xi32>
    %c32_i32_16 = arith.constant 32 : i32
    %45 = vector.broadcast %c32_i32_16 : i32 to vector<48x48xi32>
    %46 = arith.cmpi slt, %11, %45 : vector<48x48xi32>
    %47 = arith.ori %44, %46 : vector<48x48xi1>
    %48 = arith.andi %42, %47 : vector<48x48xi1>
    %49 = arith.ori %31, %48 : vector<48x48xi1>
    %cst_17 = arith.constant 0.000000e+00 : f32
    %cst_18 = arith.constant -1.000000e+30 : f32
    %50 = vector.broadcast %cst_17 : f32 to vector<48x48xf32>
    %51 = vector.broadcast %cst_18 : f32 to vector<48x48xf32>
    %52 = arith.select %49, %50, %51 : vector<48x48xi1>, vector<48x48xf32>
    %53 = tpu.iota {dimensions = array<i32: 1>} : vector<48x32xi32>
    %cst_19 = arith.constant 0.000000e+00 : f32
    %54 = vector.broadcast %cst_19 : f32 to vector<48x32xf32>
    %c0_i32_20 = arith.constant 0 : i32
    %55 = vector.broadcast %c0_i32_20 : i32 to vector<48x32xi32>
    %56 = arith.cmpi sge, %53, %55 : vector<48x32xi32>
    %c8_i32_21 = arith.constant 8 : i32
    %57 = vector.broadcast %c8_i32_21 : i32 to vector<48x32xi32>
    %58 = arith.cmpi slt, %53, %57 : vector<48x32xi32>
    %59 = arith.andi %56, %58 : vector<48x32xi1>
    %cst_22 = arith.constant 0.000000e+00 : f32
    %60 = vector.broadcast %cst_22 : f32 to vector<48x32xf32>
    %61 = arith.select %59, %3, %60 : vector<48x32xi1>, vector<48x32xf32>
    %62 = arith.truncf %61 : vector<48x32xf32> to vector<48x32xbf16>
    %cst_23 = arith.constant dense<0.000000e+00> : vector<48x48xf32>
    %63 = tpu.matmul %62, %8, %cst_23 {dimension_numbers = #tpu.dot_dimension_numbers<[1], [1], [0], [0], [0, 0, 1, 0], [], []>} : vector<48x32xbf16>, vector<48x32xbf16>, vector<48x48xf32> -> vector<48x48xf32>
    %64 = arith.addf %63, %52 : vector<48x48xf32>
    %cst_24 = arith.constant dense<0xFF800000> : vector<48xf32>
    %65 = vector.multi_reduction <maximumf>, %64, %cst_24 [1] : vector<48x48xf32> to vector<48xf32>
    %66 = vector.shape_cast %65 : vector<48xf32> to vector<48x1xf32>
    %67 = vector.broadcast %66 : vector<48x1xf32> to vector<48x48xf32>
    %68 = arith.subf %64, %67 : vector<48x48xf32>
    %69 = math.exp %68 : vector<48x48xf32>
    %cst_25 = arith.constant dense<0.000000e+00> : vector<48xf32>
    %70 = vector.multi_reduction <add>, %69, %cst_25 [1] : vector<48x48xf32> to vector<48xf32>
    %71 = vector.shape_cast %70 : vector<48xf32> to vector<48x1xf32>
    %72 = vector.broadcast %71 : vector<48x1xf32> to vector<48x48xf32>
    %73 = arith.divf %69, %72 : vector<48x48xf32>
    %74 = arith.truncf %73 : vector<48x48xf32> to vector<48x48xbf16>
    %cst_26 = arith.constant dense<0.000000e+00> : vector<48x32xf32>
    %75 = tpu.matmul %74, %9, %cst_26 {dimension_numbers = #tpu.dot_dimension_numbers<[1], [0], [0], [1], [0, 0, 1, 1], [], []>} : vector<48x48xbf16>, vector<48x32xbf16>, vector<48x32xf32> -> vector<48x32xf32>
    %76 = arith.select %59, %75, %54 : vector<48x32xi1>, vector<48x32xf32>
    %c8_i32_27 = arith.constant 8 : i32
    %77 = vector.broadcast %c8_i32_27 : i32 to vector<48x32xi32>
    %78 = arith.cmpi sge, %53, %77 : vector<48x32xi32>
    %c16_i32 = arith.constant 16 : i32
    %79 = vector.broadcast %c16_i32 : i32 to vector<48x32xi32>
    %80 = arith.cmpi slt, %53, %79 : vector<48x32xi32>
    %81 = arith.andi %78, %80 : vector<48x32xi1>
    %cst_28 = arith.constant 0.000000e+00 : f32
    %82 = vector.broadcast %cst_28 : f32 to vector<48x32xf32>
    %83 = arith.select %81, %3, %82 : vector<48x32xi1>, vector<48x32xf32>
    %84 = arith.truncf %83 : vector<48x32xf32> to vector<48x32xbf16>
    %cst_29 = arith.constant dense<0.000000e+00> : vector<48x48xf32>
    %85 = tpu.matmul %84, %8, %cst_29 {dimension_numbers = #tpu.dot_dimension_numbers<[1], [1], [0], [0], [0, 0, 1, 0], [], []>} : vector<48x32xbf16>, vector<48x32xbf16>, vector<48x48xf32> -> vector<48x48xf32>
    %86 = arith.addf %85, %52 : vector<48x48xf32>
    %cst_30 = arith.constant dense<0xFF800000> : vector<48xf32>
    %87 = vector.multi_reduction <maximumf>, %86, %cst_30 [1] : vector<48x48xf32> to vector<48xf32>
    %88 = vector.shape_cast %87 : vector<48xf32> to vector<48x1xf32>
    %89 = vector.broadcast %88 : vector<48x1xf32> to vector<48x48xf32>
    %90 = arith.subf %86, %89 : vector<48x48xf32>
    %91 = math.exp %90 : vector<48x48xf32>
    %cst_31 = arith.constant dense<0.000000e+00> : vector<48xf32>
    %92 = vector.multi_reduction <add>, %91, %cst_31 [1] : vector<48x48xf32> to vector<48xf32>
    %93 = vector.shape_cast %92 : vector<48xf32> to vector<48x1xf32>
    %94 = vector.broadcast %93 : vector<48x1xf32> to vector<48x48xf32>
    %95 = arith.divf %91, %94 : vector<48x48xf32>
    %96 = arith.truncf %95 : vector<48x48xf32> to vector<48x48xbf16>
    %cst_32 = arith.constant dense<0.000000e+00> : vector<48x32xf32>
    %97 = tpu.matmul %96, %9, %cst_32 {dimension_numbers = #tpu.dot_dimension_numbers<[1], [0], [0], [1], [0, 0, 1, 1], [], []>} : vector<48x48xbf16>, vector<48x32xbf16>, vector<48x32xf32> -> vector<48x32xf32>
    %98 = arith.select %81, %97, %76 : vector<48x32xi1>, vector<48x32xf32>
    %c16_i32_33 = arith.constant 16 : i32
    %99 = vector.broadcast %c16_i32_33 : i32 to vector<48x32xi32>
    %100 = arith.cmpi sge, %53, %99 : vector<48x32xi32>
    %c24_i32_34 = arith.constant 24 : i32
    %101 = vector.broadcast %c24_i32_34 : i32 to vector<48x32xi32>
    %102 = arith.cmpi slt, %53, %101 : vector<48x32xi32>
    %103 = arith.andi %100, %102 : vector<48x32xi1>
    %cst_35 = arith.constant 0.000000e+00 : f32
    %104 = vector.broadcast %cst_35 : f32 to vector<48x32xf32>
    %105 = arith.select %103, %3, %104 : vector<48x32xi1>, vector<48x32xf32>
    %106 = arith.truncf %105 : vector<48x32xf32> to vector<48x32xbf16>
    %cst_36 = arith.constant dense<0.000000e+00> : vector<48x48xf32>
    %107 = tpu.matmul %106, %8, %cst_36 {dimension_numbers = #tpu.dot_dimension_numbers<[1], [1], [0], [0], [0, 0, 1, 0], [], []>} : vector<48x32xbf16>, vector<48x32xbf16>, vector<48x48xf32> -> vector<48x48xf32>
    %108 = arith.addf %107, %52 : vector<48x48xf32>
    %cst_37 = arith.constant dense<0xFF800000> : vector<48xf32>
    %109 = vector.multi_reduction <maximumf>, %108, %cst_37 [1] : vector<48x48xf32> to vector<48xf32>
    %110 = vector.shape_cast %109 : vector<48xf32> to vector<48x1xf32>
    %111 = vector.broadcast %110 : vector<48x1xf32> to vector<48x48xf32>
    %112 = arith.subf %108, %111 : vector<48x48xf32>
    %113 = math.exp %112 : vector<48x48xf32>
    %cst_38 = arith.constant dense<0.000000e+00> : vector<48xf32>
    %114 = vector.multi_reduction <add>, %113, %cst_38 [1] : vector<48x48xf32> to vector<48xf32>
    %115 = vector.shape_cast %114 : vector<48xf32> to vector<48x1xf32>
    %116 = vector.broadcast %115 : vector<48x1xf32> to vector<48x48xf32>
    %117 = arith.divf %113, %116 : vector<48x48xf32>
    %118 = arith.truncf %117 : vector<48x48xf32> to vector<48x48xbf16>
    %cst_39 = arith.constant dense<0.000000e+00> : vector<48x32xf32>
    %119 = tpu.matmul %118, %9, %cst_39 {dimension_numbers = #tpu.dot_dimension_numbers<[1], [0], [0], [1], [0, 0, 1, 1], [], []>} : vector<48x48xbf16>, vector<48x32xbf16>, vector<48x32xf32> -> vector<48x32xf32>
    %120 = arith.select %103, %119, %98 : vector<48x32xi1>, vector<48x32xf32>
    %c24_i32_40 = arith.constant 24 : i32
    %121 = vector.broadcast %c24_i32_40 : i32 to vector<48x32xi32>
    %122 = arith.cmpi sge, %53, %121 : vector<48x32xi32>
    %c32_i32_41 = arith.constant 32 : i32
    %123 = vector.broadcast %c32_i32_41 : i32 to vector<48x32xi32>
    %124 = arith.cmpi slt, %53, %123 : vector<48x32xi32>
    %125 = arith.andi %122, %124 : vector<48x32xi1>
    %cst_42 = arith.constant 0.000000e+00 : f32
    %126 = vector.broadcast %cst_42 : f32 to vector<48x32xf32>
    %127 = arith.select %125, %3, %126 : vector<48x32xi1>, vector<48x32xf32>
    %128 = arith.truncf %127 : vector<48x32xf32> to vector<48x32xbf16>
    %cst_43 = arith.constant dense<0.000000e+00> : vector<48x48xf32>
    %129 = tpu.matmul %128, %8, %cst_43 {dimension_numbers = #tpu.dot_dimension_numbers<[1], [1], [0], [0], [0, 0, 1, 0], [], []>} : vector<48x32xbf16>, vector<48x32xbf16>, vector<48x48xf32> -> vector<48x48xf32>
    %130 = arith.addf %129, %52 : vector<48x48xf32>
    %cst_44 = arith.constant dense<0xFF800000> : vector<48xf32>
    %131 = vector.multi_reduction <maximumf>, %130, %cst_44 [1] : vector<48x48xf32> to vector<48xf32>
    %132 = vector.shape_cast %131 : vector<48xf32> to vector<48x1xf32>
    %133 = vector.broadcast %132 : vector<48x1xf32> to vector<48x48xf32>
    %134 = arith.subf %130, %133 : vector<48x48xf32>
    %135 = math.exp %134 : vector<48x48xf32>
    %cst_45 = arith.constant dense<0.000000e+00> : vector<48xf32>
    %136 = vector.multi_reduction <add>, %135, %cst_45 [1] : vector<48x48xf32> to vector<48xf32>
    %137 = vector.shape_cast %136 : vector<48xf32> to vector<48x1xf32>
    %138 = vector.broadcast %137 : vector<48x1xf32> to vector<48x48xf32>
    %139 = arith.divf %135, %138 : vector<48x48xf32>
    %140 = arith.truncf %139 : vector<48x48xf32> to vector<48x48xbf16>
    %cst_46 = arith.constant dense<0.000000e+00> : vector<48x32xf32>
    %141 = tpu.matmul %140, %9, %cst_46 {dimension_numbers = #tpu.dot_dimension_numbers<[1], [0], [0], [1], [0, 0, 1, 1], [], []>} : vector<48x48xbf16>, vector<48x32xbf16>, vector<48x32xf32> -> vector<48x32xf32>
    %142 = arith.select %125, %141, %120 : vector<48x32xi1>, vector<48x32xf32>
    %143 = arith.truncf %142 : vector<48x32xf32> to vector<48x32xbf16>
    %c0_47 = arith.constant 0 : index
    %c0_48 = arith.constant 0 : index
    %144 = vector.load %arg5[%c0_47, %c0_48] : memref<32x32xbf16, #tpu.memory_space<vmem>>, vector<32x32xbf16>
    %cst_49 = arith.constant dense<0.000000e+00> : vector<48x32xf32>
    %145 = tpu.matmul %143, %144, %cst_49 {dimension_numbers = #tpu.dot_dimension_numbers<[1], [0], [0], [1], [0, 0, 1, 1], [], []>} : vector<48x32xbf16>, vector<32x32xbf16>, vector<48x32xf32> -> vector<48x32xf32>
    %c0_50 = arith.constant 0 : index
    %c0_51 = arith.constant 0 : index
    %146 = vector.load %arg6[%c0_50, %c0_51] : memref<1x32xf32, #tpu.memory_space<vmem>>, vector<1x32xf32>
    %147 = vector.broadcast %146 : vector<1x32xf32> to vector<48x32xf32>
    %148 = arith.addf %145, %147 : vector<48x32xf32>
    %c0_52 = arith.constant 0 : index
    %c0_53 = arith.constant 0 : index
    %149 = vector.load %arg7[%c0_52, %c0_53] : memref<48x32xf32, #tpu.memory_space<vmem>>, vector<48x32xf32>
    tpu.vector_store %arg7[%c0_52, %c0_53], %148 {strides = array<i32>} : memref<48x32xf32, #tpu.memory_space<vmem>>, vector<48x32xf32>,
    return
  }
  func.func @transform_0(%arg0: i32) -> (i32, i32) {
    %c0_i32 = arith.constant 0 : i32
    %c0_i32_0 = arith.constant 0 : i32
    return %arg0, %c0_i32 : i32, i32
  }
  func.func @transform_1(%arg0: i32) -> (i32, i32) {
    %c0_i32 = arith.constant 0 : i32
    %c0_i32_0 = arith.constant 0 : i32
    %c0_i32_1 = arith.constant 0 : i32
    return %c0_i32, %c0_i32_0 : i32, i32
  }
  func.func @transform_2(%arg0: i32) -> (i32, i32) {
    %c0_i32 = arith.constant 0 : i32
    %c0_i32_0 = arith.constant 0 : i32
    %c0_i32_1 = arith.constant 0 : i32
    return %c0_i32, %c0_i32_0 : i32, i32
  }
  func.func @transform_3(%arg0: i32) -> (i32, i32) {
    %c0_i32 = arith.constant 0 : i32
    %c0_i32_0 = arith.constant 0 : i32
    %c0_i32_1 = arith.constant 0 : i32
    return %c0_i32, %c0_i32_0 : i32, i32
  }
  func.func @transform_4(%arg0: i32) -> (i32, i32) {
    %c0_i32 = arith.constant 0 : i32
    %c0_i32_0 = arith.constant 0 : i32
    %c0_i32_1 = arith.constant 0 : i32
    return %c0_i32, %c0_i32_0 : i32, i32
  }
  func.func @transform_5(%arg0: i32) -> (i32, i32) {
    %c0_i32 = arith.constant 0 : i32
    %c0_i32_0 = arith.constant 0 : i32
    %c0_i32_1 = arith.constant 0 : i32
    return %c0_i32, %c0_i32_0 : i32, i32
  }
  func.func @transform_6(%arg0: i32) -> (i32, i32) {
    %c0_i32 = arith.constant 0 : i32
    %c0_i32_0 = arith.constant 0 : i32
    return %arg0, %c0_i32 : i32, i32
  }
}

</mosaic_0001>

<bundles_post_ra>
// kernel: tpu_custom_call.1
= control target key start
LH: loop header
LB: loop body
LE: loop exit
PB: predicated region body
PF: predicated region fallthrough
CT: control target
= control target key end

     0   :  { %v1804_v0 = vmov 0.0   ;;  %vm1805_vm0 = vmmov 0   ;;  %vm49_vm1 = vcmask 261120   ;;  %v275_v14 = vlaneseq  ;;  %s2547_s2 = inlined_call_operand.vmem [shape: bf16[32,32], index: 2, kind: input, shape index: {}]   ;;  %s2548_s0 = inlined_call_operand.vmem [shape: f32[48,32], index: 0, kind: input, shape index: {}]   ;;  %s2549_s1 = inlined_call_operand.vmem [shape: bf16[32,32], index: 1, kind: input, shape index: {}]   ;;  %s2550_s3 = inlined_call_operand.vmem [shape: bf16[32,32], index: 3, kind: input, shape index: {}]   ;;  %s2551_s4 = inlined_call_operand.vmem [shape: bf16[32,32], index: 4, kind: input, shape index: {}]   ;;  %s2552_s5 = inlined_call_operand.vmem [shape: f32[1,32], index: 5, kind: input, shape index: {}]   ;;  %s2553_s6 = inlined_call_operand.vmem [shape: f32[48,32], index: 6, kind: output, shape index: {}]  }
   0x1   :  { %1505 = vmatprep.subr.bf16.mxu1 %v1804_v0  ;;  %v1700_v1 = vld [vmem:[%s2547_s2 + $0x8] sm:$0xff]   ;;  %1509 = vmatprep.mubr.msk.bf16.mxu1 %vm1805_vm0, %v1804_v0  ;;  %v1701_v2 = vld [vmem:[%s2547_s2] sm:$0xff]   ;;  %v26_v8 = vld [vmem:[%s2548_s0 + $0x10] sm:$0xff]  ;;  %vm478_vm13 = vcmask 392192  }
   0x2   :  { %1489 = vmatprep.subr.bf16.mxu0 %v1804_v0  ;;  %1493 = vmatprep.mubr.msk.bf16.mxu0 %vm1805_vm0, %v1804_v0  ;;  %v24_v3 = vld [vmem:[%s2548_s0] sm:$0xff]  ;;  %v25_v4 = vld [vmem:[%s2548_s0 + $0x8] sm:$0xff]  ;;  %v27_v9 = vld [vmem:[%s2548_s0 + $0x18] sm:$0xff]  ;;  %v1912_v15 = vand.u32 127, %v275_v14 }
   0x3   :  { %1506 = vmatpush3.bf16.msra.mxu1 %v1700_v1  ;;  %v1702_v5 = vld [vmem:[%s2549_s1 + $0x8] sm:$0xff]   ;;  %v1864_v6 = vpack.c.bf16 %v25_v4, %v24_v3  ;;  %v1703_v7 = vld [vmem:[%s2549_s1] sm:$0xff]   ;;  %v1882_v10 = vpack.c.bf16 %v27_v9, %v26_v8 }
   0x4   :  { %1507 = vmatprep.subr.bf16.mxu1 %v1804_v0  ;;  %1490 = vmatpush3.bf16.msra.mxu0 %v1702_v5  ;;  %v28_v11 = vld [vmem:[%s2548_s0 + $0x20] sm:$0xff]  ;;  %v29_v12 = vld [vmem:[%s2548_s0 + $0x28] sm:$0xff]  ;;  %vm353_vm2 = vcmp.ge.s32.totalorder %v1912_v15, 24  ;;  %vm368_vm3 = vcmp.lt.s32.totalorder %v1912_v15, 32  ;;  %vm302_vm4 = vcmp.lt.s32.totalorder %v1912_v15, 24  ;;  %vm839_vm5 = vcmp.ge.s32.totalorder %v1912_v15, 16 }
   0x5   :  { %1491 = vmatprep.subr.bf16.mxu0 %v1804_v0  ;;  %v1898_v13 = vpack.c.bf16 %v29_v12, %v28_v11  ;;  %vm1922_vm6 = vmand %vm353_vm2, %vm368_vm3  ;;  %vm316_vm8 = vcmp.lt.s32.totalorder %v1912_v15, 8  ;;  %vm620_vm9 = vcmp.ge.s32.totalorder %v1912_v15, 8  ;;  %vm621_vm10 = vcmp.lt.s32.totalorder %v1912_v15, 16 }
   0x6   :  { %vm1930_vm7 = vmand %vm839_vm5, %vm302_vm4  ;;  %vm354_vm14 = vcmp.lt.s32.totalorder %v1912_v15, 48 }
   0x7   :  { %1508 = vmatpush3.bf16.msra.mxu1 %v1701_v2  ;;  %vm2026_vm11 = vmand %vm620_vm9, %vm621_vm10 }
   0x8   :  { %1537 = vmatprep.subr.bf16.mxu1 %v1804_v0  ;;  %1492 = vmatpush3.bf16.msra.mxu0 %v1703_v7  ;;  %vm323_vm12 = vmand %vm302_vm4, %vm316_vm8 }
   0x9   :  { %1521 = vmatprep.subr.bf16.mxu0 %v1804_v0  ;;  %vm355_vm15 = vmand %vm353_vm2, %vm354_vm14 }
   0xa   :  { %1510 = vmatmul.mubr.msk.bf16.vlgmr.msra.gmra.mxu1 %vm49_vm1, %v1864_v6 }
   0xb   :  { %1513 = vmatprep.mubr.msk.bf16.mxu1 %vm1805_vm0, %v1804_v0  ;;  %1494 = vmatmul.mubr.msk.bf16.vlgmr.msra.gmra.mxu0 %vm49_vm1, %v1864_v6 }
   0xc   :  { %1497 = vmatprep.mubr.msk.bf16.mxu0 %vm1805_vm0, %v1804_v0 }
  0x12   :  { %1514 = vmatmul.mubr.msk.bf16.gmra.mxu1 %vm49_vm1, %v1882_v10 }
  0x13   :  { %1517 = vmatprep.mubr.msk.bf16.mxu1 %vm1805_vm0, %v1804_v0  ;;  %1498 = vmatmul.mubr.msk.bf16.gmra.mxu0 %vm49_vm1, %v1882_v10 }
  0x14   :  { %1501 = vmatprep.mubr.msk.bf16.mxu0 %vm1805_vm0, %v1804_v0 }
  0x1a   :  { %1518 = vmatmul.mubr.msk.bf16.gmra.mxu1 %vm49_vm1, %v1898_v13 }
  0x1b   :  { %1543 = vmatprep.mubr.msk.bf16.mxu1 %vm1805_vm0, %v1804_v0  ;;  %1502 = vmatmul.mubr.msk.bf16.gmra.mxu0 %vm49_vm1, %v1898_v13 }
  0x1c   :  { %1525 = vmatprep.mubr.msk.bf16.mxu0 %vm1805_vm0, %v1804_v0 }
  0xca   :  { %v166_v16 = vpop.f32.mrf.mxu1 }
  0xcb   :  { %v1926_v20 = vpop.f32.mrf.mxu0 }
  0xcc   :  { %v1511_v17 = vpop.f32.mrf.mxu1  ;;  %v841_v24 = vsel %vm1930_vm7, %v1926_v20, 0.0  ;;  %v1058_v25 = vsel %vm1922_vm6, %v1926_v20, 0.0  ;;  %v394_v3 = vsel %vm316_vm8, %v1926_v20, 0.0 }
  0xcd   :  { %v1495_v23 = vpop.f32.mrf.mxu0  ;;  %v623_v17 = vsel %vm2026_vm11, %v1926_v20, 0.0 }
  0xce   :  { %v169_v19 = vpop.f32.mrf.mxu1 }
  0xcf   :  { %v1940_v27 = vpop.f32.mrf.mxu0  ;;  %v262_v1 = vpack.c.bf16 %v169_v19, %v166_v16  ;;  %v1415_v16 = vld [vmem:[%s2552_s5] ss:$0 sm:$0xff] }
  0xd0   :  { %v1512_v22 = vpop.f32.mrf.mxu1  ;;  %v842_v28 = vsel %vm1930_vm7, %v1940_v27, 0.0  ;;  %v1059_v29 = vsel %vm1922_vm6, %v1940_v27, 0.0  ;;  %v395_v4 = vsel %vm316_vm8, %v1940_v27, 0.0  ;;  %v624_v19 = vsel %vm2026_vm11, %v1940_v27, 0.0 }
  0xd1   :  { %v1948_v31 = vpack.c.bf16 %v842_v28, %v841_v24  ;;  %v1950_v32 = vpack.c.bf16 %v1059_v29, %v1058_v25  ;;  %v1496_v33 = vpop.f32.mrf.mxu0  ;;  %v413_v2 = vsel %vm49_vm1, %v262_v1, 0  ;;  %v400_v5 = vpack.c.bf16 %v395_v4, %v394_v3  ;;  %v1704_v28 = vld [vmem:[%s2550_s3 + $0x8] sm:$0xff]   ;;  %v1705_v29 = vld [vmem:[%s2550_s3] sm:$0xff]  }
  0xd2   :  { %v174_v26 = vpop.f32.mrf.mxu1  ;;  %v629_v22 = vpack.c.bf16 %v624_v19, %v623_v17  ;;  %1522 = vmatpush3.bf16.msra.mxu0 %v1704_v28 }
  0xd3   :  { %v1952_v35 = vpop.f32.mrf.mxu0  ;;  %1523 = vmatprep.subr.bf16.mxu0 %v1804_v0 }
  0xd4   :  { %v1515_v30 = vpop.f32.mrf.mxu1  ;;  %v843_v38 = vsel %vm1930_vm7, %v1952_v35, 0.0  ;;  %v1060_v39 = vsel %vm1922_vm6, %v1952_v35, 0.0  ;;  %v396_v7 = vsel %vm316_vm8, %v1952_v35, 0.0  ;;  %v625_v23 = vsel %vm2026_vm11, %v1952_v35, 0.0 }
  0xd5   :  { %v1499_v37 = vpop.f32.mrf.mxu0 }
  0xd6   :  { %v177_v34 = vpop.f32.mrf.mxu1  ;;  %1524 = vmatpush3.bf16.msra.mxu0 %v1705_v29 }
  0xd7   :  { %v1960_v41 = vpop.f32.mrf.mxu0  ;;  %v263_v62 = vpack.c.bf16 %v177_v34, %v174_v26  ;;  %1555 = vmatprep.subr.bf16.mxu0 %v1804_v0 }
  0xd8   :  { %v1516_v36 = vpop.f32.mrf.mxu1  ;;  %v844_v42 = vsel %vm1930_vm7, %v1960_v41, 0.0  ;;  %v1061_v43 = vsel %vm1922_vm6, %v1960_v41, 0.0  ;;  %v397_v8 = vsel %vm316_vm8, %v1960_v41, 0.0  ;;  %v626_v20 = vsel %vm2026_vm11, %v1960_v41, 0.0 }
  0xd9   :  { %v1968_v45 = vpack.c.bf16 %v844_v42, %v843_v38  ;;  %v1970_v46 = vpack.c.bf16 %v1061_v43, %v1060_v39  ;;  %v1500_v47 = vpop.f32.mrf.mxu0  ;;  %v416_v63 = vsel %vm49_vm1, %v263_v62, 0  ;;  %v401_v9 = vpack.c.bf16 %v397_v8, %v396_v7  ;;  %1526 = vmatmul.mubr.msk.bf16.vlgmr.msra.gmra.mxu0 %vm49_vm1, %v1864_v6 }
  0xda   :  { %v182_v40 = vpop.f32.mrf.mxu1  ;;  %v630_v24 = vpack.c.bf16 %v626_v20, %v625_v23  ;;  %1529 = vmatprep.mubr.msk.bf16.mxu0 %vm1805_vm0, %v1804_v0  ;;  %v1806_v6 = vmov -1e+30  }
  0xdb   :  { %v1972_v49 = vpop.f32.mrf.mxu0  ;;  %v2116_v30 = vsel %vm323_vm12, 0.0, %v1806_v6 }
  0xdc   :  { %v1519_v44 = vpop.f32.mrf.mxu1  ;;  %v845_v54 = vsel %vm1930_vm7, %v1972_v49, 0.0  ;;  %v1062_v55 = vsel %vm1922_vm6, %v1972_v49, 0.0  ;;  %v398_v11 = vsel %vm316_vm8, %v1972_v49, 0.0  ;;  %v627_v25 = vsel %vm2026_vm11, %v1972_v49, 0.0 }
  0xdd   :  { %v1503_v52 = vpop.f32.mrf.mxu0 }
  0xde   :  { %v185_v48 = vpop.f32.mrf.mxu1 }
  0xdf   :  { %v264_v50 = vpack.c.bf16 %v185_v48, %v182_v40  ;;  %v112_v56 = vpop.f32.mrf.mxu0 }
  0xe0   :  { %v1520_v51 = vpop.f32.mrf.mxu1  ;;  %v846_v57 = vsel %vm1930_vm7, %v112_v56, 0.0  ;;  %v1063_v58 = vsel %vm1922_vm6, %v112_v56, 0.0  ;;  %v399_v12 = vsel %vm316_vm8, %v112_v56, 0.0  ;;  %v628_v26 = vsel %vm2026_vm11, %v112_v56, 0.0 }
  0xe1   :  { %v1975_v53 = vsel %vm49_vm1, %v264_v50, 0  ;;  %v1989_v59 = vpack.c.bf16 %v846_v57, %v845_v54  ;;  %v1991_v60 = vpack.c.bf16 %v1063_v58, %v1062_v55  ;;  %v1504_v61 = vpop.f32.mrf.mxu0  ;;  %v402_v14 = vpack.c.bf16 %v399_v12, %v398_v11  ;;  %1530 = vmatmul.mubr.msk.bf16.gmra.mxu0 %vm49_vm1, %v1882_v10 }
  0xe2   :  { %1538 = vmatpush3.bf16.xpose.msra.mxu1 %v1975_v53  ;;  %v631_v27 = vpack.c.bf16 %v628_v26, %v627_v25  ;;  %1533 = vmatprep.mubr.msk.bf16.mxu0 %vm1805_vm0, %v1804_v0 }
  0xe3   :  { %1539 = vmatprep.subr.bf16.mxu1 %v1804_v0 }
  0xe9   :  { %1534 = vmatmul.mubr.msk.bf16.gmra.mxu0 %vm49_vm1, %v1898_v13  ;;  %v2124_v13 = vsel %vm302_vm4, 0.0, %v1806_v6  ;;  %vm378_vm4 = vmand %vm355_vm15, %vm368_vm3 }
  0xea   :  { %1540 = vmatpush3.bf16.xpose.msra.mxu1 %v416_v63  ;;  %1561 = vmatprep.mubr.msk.bf16.mxu0 %vm1805_vm0, %v1804_v0  ;;  %v2140_v41 = vsel %vm378_vm4, 0.0, %v1806_v6 }
  0xeb   :  { %1541 = vmatprep.subr.bf16.mxu1 %v1804_v0 }
  0xf2   :  { %1542 = vmatpush3.bf16.xpose.msra.mxu1 %v413_v2 }
  0xf3   :  { %1573 = vmatprep.subr.bf16.mxu1 %v1804_v0 }
  0xf9   :  { %1544 = vmatmul.mubr.msk.bf16.vlgmr.msra.gmra.mxu1 %vm49_vm1, %v400_v5 }
  0xfa   :  { %1574 = vmatpush3.bf16.xpose.msra.mxu1 %v1975_v53  ;;  %1547 = vmatprep.mubr.msk.bf16.mxu1 %vm1805_vm0, %v1804_v0 }
  0xfb   :  { %1575 = vmatprep.subr.bf16.mxu1 %v1804_v0 }
 0x101   :  { %1548 = vmatmul.mubr.msk.bf16.gmra.mxu1 %vm49_vm1, %v401_v9 }
 0x102   :  { %1576 = vmatpush3.bf16.xpose.msra.mxu1 %v416_v63  ;;  %1551 = vmatprep.mubr.msk.bf16.mxu1 %vm1805_vm0, %v1804_v0 }
 0x103   :  { %1577 = vmatprep.subr.bf16.mxu1 %v1804_v0 }
 0x109   :  { %1552 = vmatmul.mubr.msk.bf16.gmra.mxu1 %vm49_vm1, %v402_v14 }
 0x10a   :  { %1578 = vmatpush3.bf16.xpose.msra.mxu1 %v413_v2  ;;  %1579 = vmatprep.mubr.msk.bf16.mxu1 %vm1805_vm0, %v1804_v0 }
 0x10b   :  { %1609 = vmatprep.subr.bf16.mxu1 %v1804_v0 }
 0x111   :  { %1580 = vmatmul.mubr.msk.bf16.vlgmr.msra.gmra.mxu1 %vm49_vm1, %v629_v22 }
 0x112   :  { %1610 = vmatpush3.bf16.xpose.msra.mxu1 %v1975_v53  ;;  %1583 = vmatprep.mubr.msk.bf16.mxu1 %vm1805_vm0, %v1804_v0 }
 0x113   :  { %1611 = vmatprep.subr.bf16.mxu1 %v1804_v0 }
 0x119   :  { %1584 = vmatmul.mubr.msk.bf16.gmra.mxu1 %vm49_vm1, %v630_v24 }
 0x11a   :  { %1612 = vmatpush3.bf16.xpose.msra.mxu1 %v416_v63  ;;  %1587 = vmatprep.mubr.msk.bf16.mxu1 %vm1805_vm0, %v1804_v0 }
 0x11b   :  { %1613 = vmatprep.subr.bf16.mxu1 %v1804_v0 }
 0x121   :  { %1588 = vmatmul.mubr.msk.bf16.gmra.mxu1 %vm49_vm1, %v631_v27 }
 0x122   :  { %1614 = vmatpush3.bf16.xpose.msra.mxu1 %v413_v2  ;;  %1615 = vmatprep.mubr.msk.bf16.mxu1 %vm1805_vm0, %v1804_v0 }
 0x123   :  { %1645 = vmatprep.subr.bf16.mxu1 %v1804_v0 }
 0x129   :  { %1616 = vmatmul.mubr.msk.bf16.vlgmr.msra.gmra.mxu1 %vm49_vm1, %v1948_v31 }
 0x12a   :  { %1646 = vmatpush3.bf16.xpose.msra.mxu1 %v1975_v53  ;;  %1619 = vmatprep.mubr.msk.bf16.mxu1 %vm1805_vm0, %v1804_v0 }
 0x12b   :  { %1647 = vmatprep.subr.bf16.mxu1 %v1804_v0 }
 0x131   :  { %1620 = vmatmul.mubr.msk.bf16.gmra.mxu1 %vm49_vm1, %v1968_v45  ;;  %v2147_v45 = vsel %vm355_vm15, 0.0, %v1806_v6 }
 0x132   :  { %1648 = vmatpush3.bf16.xpose.msra.mxu1 %v416_v63  ;;  %1623 = vmatprep.mubr.msk.bf16.mxu1 %vm1805_vm0, %v1804_v0 }
 0x133   :  { %1649 = vmatprep.subr.bf16.mxu1 %v1804_v0 }
 0x139   :  { %1624 = vmatmul.mubr.msk.bf16.gmra.mxu1 %vm49_vm1, %v1989_v59 }
 0x13a   :  { %1650 = vmatpush3.bf16.xpose.msra.mxu1 %v413_v2  ;;  %1651 = vmatprep.mubr.msk.bf16.mxu1 %vm1805_vm0, %v1804_v0 }
 0x13b   :  { %1681 = vmatprep.subr.bf16.mxu1 %v1804_v0 }
 0x141   :  { %1652 = vmatmul.mubr.msk.bf16.vlgmr.msra.gmra.mxu1 %vm49_vm1, %v1950_v32 }
 0x142   :  { %1655 = vmatprep.mubr.msk.bf16.mxu1 %vm1805_vm0, %v1804_v0 }
 0x149   :  { %1656 = vmatmul.mubr.msk.bf16.gmra.mxu1 %vm49_vm1, %v1970_v46 }
 0x14a   :  { %1659 = vmatprep.mubr.msk.bf16.mxu1 %vm1805_vm0, %v1804_v0 }
 0x151   :  { %1660 = vmatmul.mubr.msk.bf16.gmra.mxu1 %vm49_vm1, %v1991_v60 }
 0x152   :  { %1685 = vmatprep.mubr.msk.bf16.mxu1 %vm1805_vm0, %v1804_v0 }
 0x1b9   :  { %v455_v31 = vpop.f32.mrf.mxu1 }
 0x1ba   :  { %v2119_v10 = vadd.f32 %v455_v31, %v2116_v30 }
 0x1bb   :  { %v1545_v32 = vpop.f32.mrf.mxu1 }
 0x1bc   :  { %v479_v33 = vsel %vm478_vm13, %v2119_v10, -inf }
 0x1bd   :  { %480 = vmax.xlane.f32.xlu0 %v479_v33  ;;  %v458_v34 = vpop.f32.mrf.mxu1 }
 0x1be   :  { %v2131_v35 = vadd.f32 %v458_v34, %v2124_v13 }
 0x1bf   :  { %v1546_v36 = vpop.f32.mrf.mxu1 }
 0x1c0   :  { %v482_v37 = vsel %vm478_vm13, %v2131_v35, -inf }
 0x1c1   :  { %483 = vmax.xlane.f32.xlu0 %v482_v37  ;;  %v463_v38 = vpop.f32.mrf.mxu1 }
 0x1c2   :  { %v2138_v39 = vadd.f32 %v463_v38, %v2124_v13 }
 0x1c3   :  { %v1549_v40 = vpop.f32.mrf.mxu1 }
 0x1c4   :  { %v485_v42 = vsel %vm478_vm13, %v2138_v39, -inf }
 0x1c5   :  { %486 = vmax.xlane.f32.xlu1 %v485_v42  ;;  %v466_v43 = vpop.f32.mrf.mxu1 }
 0x1c6   :  { %v2145_v44 = vadd.f32 %v466_v43, %v2140_v41 }
 0x1c7   :  { %v1550_v46 = vpop.f32.mrf.mxu1 }
 0x1c8   :  { %v488_v47 = vsel %vm478_vm13, %v2145_v44, -inf }
 0x1c9   :  { %489 = vmax.xlane.f32.xlu1 %v488_v47  ;;  %v471_v48 = vpop.f32.mrf.mxu1 }
 0x1ca   :  { %v2152_v49 = vadd.f32 %v471_v48, %v2147_v45 }
 0x1cb   :  { %v1553_v50 = vpop.f32.mrf.mxu1 }
 0x1cc   :  { %v491_v51 = vsel %vm478_vm13, %v2152_v49, -inf }
 0x1cd   :  { %492 = vmax.xlane.f32.xlu0 %v491_v51  ;;  %v474_v52 = vpop.f32.mrf.mxu1 }
 0x1ce   :  { %v2157_v53 = vadd.f32 %v474_v52, %v2147_v45 }
 0x1cf   :  { %v1554_v54 = vpop.f32.mrf.mxu1 }
 0x1d0   :  { %v494_v55 = vsel %vm478_vm13, %v2157_v53, -inf }
 0x1d1   :  { %495 = vmax.xlane.f32.xlu1 %v494_v55  ;;  %v675_v56 = vpop.f32.mrf.mxu1 }
 0x1d2   :  { %v2162_v57 = vadd.f32 %v675_v56, %v2116_v30 }
 0x1d3   :  { %v1581_v58 = vpop.f32.mrf.mxu1 }
 0x1d4   :  { %v698_v59 = vsel %vm478_vm13, %v2162_v57, -inf }
 0x1d5   :  { %699 = vmax.xlane.f32.xlu0 %v698_v59  ;;  %v678_v60 = vpop.f32.mrf.mxu1 }
 0x1d6   :  { %v2167_v61 = vadd.f32 %v678_v60, %v2124_v13 }
 0x1d7   :  { %v1582_v62 = vpop.f32.mrf.mxu1 }
 0x1d8   :  { %v701_v63 = vsel %vm478_vm13, %v2167_v61, -inf }
 0x1d9   :  { %702 = vmax.xlane.f32.xlu1 %v701_v63  ;;  %v683_v1 = vpop.f32.mrf.mxu1 }
 0x1da   :  { %v2172_v2 = vadd.f32 %v683_v1, %v2124_v13 }
 0x1db   :  { %v1585_v3 = vpop.f32.mrf.mxu1 }
 0x1dc   :  { %v704_v4 = vsel %vm478_vm13, %v2172_v2, -inf }
 0x1dd   :  { %705 = vmax.xlane.f32.xlu0 %v704_v4  ;;  %v686_v5 = vpop.f32.mrf.mxu1 }
 0x1de   :  { %v2177_v7 = vadd.f32 %v686_v5, %v2140_v41 }
 0x1df   :  { %v1586_v8 = vpop.f32.mrf.mxu1 }
 0x1e0   :  { %v707_v9 = vsel %vm478_vm13, %v2177_v7, -inf }
 0x1e1   :  { %708 = vmax.xlane.f32.xlu1 %v707_v9  ;;  %v691_v11 = vpop.f32.mrf.mxu1 }
 0x1e2   :  { %v2182_v12 = vadd.f32 %v691_v11, %v2147_v45 }
 0x1e3   :  { %v1589_v14 = vpop.f32.mrf.mxu1 }
 0x1e4   :  { %v710_v17 = vsel %vm478_vm13, %v2182_v12, -inf }
 0x1e5   :  { %711 = vmax.xlane.f32.xlu0 %v710_v17  ;;  %v694_v19 = vpop.f32.mrf.mxu1 }
 0x1e6   :  { %v2187_v22 = vadd.f32 %v694_v19, %v2147_v45 }
 0x1e7   :  { %v1590_v23 = vpop.f32.mrf.mxu1 }
 0x1e8   :  { %v713_v20 = vsel %vm478_vm13, %v2187_v22, -inf }
 0x1e9   :  { %714 = vmax.xlane.f32.xlu1 %v713_v20  ;;  %v893_v24 = vpop.f32.mrf.mxu1 }
 0x1ea   :  { %v2192_v25 = vadd.f32 %v893_v24, %v2116_v30 }
 0x1eb   :  { %v1617_v26 = vpop.f32.mrf.mxu1 }
 0x1ec   :  { %v916_v27 = vsel %vm478_vm13, %v2192_v25, -inf }
 0x1ed   :  { %917 = vmax.xlane.f32.xlu0 %v916_v27  ;;  %v896_v28 = vpop.f32.mrf.mxu1  ;;  %v239_v27 = vpop.f32.mrf.mxu0 }
 0x1ee   :  { %v2197_v29 = vadd.f32 %v896_v28, %v2124_v13 }
 0x1ef   :  { %v1618_v6 = vpop.f32.mrf.mxu1  ;;  %v1527_v28 = vpop.f32.mrf.mxu0 }
 0x1f0   :  { %v919_v31 = vsel %vm478_vm13, %v2197_v29, -inf }
 0x1f1   :  { %920 = vmax.xlane.f32.xlu1 %v919_v31  ;;  %v901_v32 = vpop.f32.mrf.mxu1  ;;  %v242_v6 = vpop.f32.mrf.mxu0 }
 0x1f2   :  { %v2202_v33 = vadd.f32 %v901_v32, %v2124_v13 }
 0x1f3   :  { %v1621_v34 = vpop.f32.mrf.mxu1  ;;  %v1528_v31 = vpop.f32.mrf.mxu0 }
 0x1f4   :  { %v922_v36 = vsel %vm478_vm13, %v2202_v33, -inf }
 0x1f5   :  { %923 = vmax.xlane.f32.xlu0 %v922_v36  ;;  %v904_v37 = vpop.f32.mrf.mxu1  ;;  %v247_v32 = vpop.f32.mrf.mxu0 }
 0x1f6   :  { %v2207_v38 = vadd.f32 %v904_v37, %v2140_v41 }
 0x1f7   :  { %v1622_v40 = vpop.f32.mrf.mxu1  ;;  %v1531_v34 = vpop.f32.mrf.mxu0 }
 0x1f8   :  { %v925_v42 = vsel %vm478_vm13, %v2207_v38, -inf }
 0x1f9   :  { %926 = vmax.xlane.f32.xlu1 %v925_v42  ;;  %v909_v43 = vpop.f32.mrf.mxu1  ;;  %v250_v36 = vpop.f32.mrf.mxu0 }
 0x1fa   :  { %v2212_v46 = vadd.f32 %v909_v43, %v2147_v45 }
 0x1fb   :  { %v1625_v47 = vpop.f32.mrf.mxu1  ;;  %v1532_v37 = vpop.f32.mrf.mxu0 }
 0x1fc   :  { %v928_v48 = vsel %vm478_vm13, %v2212_v46, -inf }
 0x1fd   :  { %929 = vmax.xlane.f32.xlu0 %v928_v48  ;;  %v912_v50 = vpop.f32.mrf.mxu1  ;;  %v255_v40 = vpop.f32.mrf.mxu0 }
 0x1fe   :  { %v2217_v51 = vadd.f32 %v912_v50, %v2147_v45 }
 0x1ff   :  { %v1626_v52 = vpop.f32.mrf.mxu1  ;;  %v1535_v42 = vpop.f32.mrf.mxu0 }
 0x200   :  { %v931_v54 = vsel %vm478_vm13, %v2217_v51, -inf  ;;  %v2254_v52 = vpack.c.bf16 %v250_v36, %v247_v32 }
 0x201   :  { %932 = vmax.xlane.f32.xlu1 %v931_v54  ;;  %v1110_v55 = vpop.f32.mrf.mxu1  ;;  %v258_v43 = vpop.f32.mrf.mxu0 }
 0x202   :  { %v2222_v56 = vadd.f32 %v1110_v55, %v2116_v30  ;;  %v2251_v48 = vpack.c.bf16 %v258_v43, %v255_v40 }
 0x203   :  { %v1653_v58 = vpop.f32.mrf.mxu1  ;;  %v1536_v50 = vpop.f32.mrf.mxu0 }
 0x204   :  { %v1133_v59 = vsel %vm478_vm13, %v2222_v56, -inf  ;;  %1556 = vmatpush3.bf16.msra.mxu0 %v2251_v48 }
 0x205   :  { %1134 = vmax.xlane.f32.xlu0 %v1133_v59  ;;  %v1113_v60 = vpop.f32.mrf.mxu1  ;;  %1557 = vmatprep.subr.bf16.mxu0 %v1804_v0  ;;  %v2259_v59 = vpack.c.bf16 %v242_v6, %v239_v27 }
 0x206   :  { %v2227_v62 = vadd.f32 %v1113_v60, %v2124_v13 }
 0x207   :  { %v1654_v63 = vpop.f32.mrf.mxu1 }
 0x208   :  { %v1136_v1 = vsel %vm478_vm13, %v2227_v62, -inf  ;;  %1558 = vmatpush3.bf16.msra.mxu0 %v2254_v52 }
 0x209   :  { %1137 = vmax.xlane.f32.xlu1 %v1136_v1  ;;  %v1118_v3 = vpop.f32.mrf.mxu1  ;;  %1559 = vmatprep.subr.bf16.mxu0 %v1804_v0 }
 0x20a   :  { %v2232_v4 = vadd.f32 %v1118_v3, %v2124_v13 }
 0x20b   :  { %v1657_v30 = vpop.f32.mrf.mxu1 }
 0x20c   :  { %v1139_v5 = vsel %vm478_vm13, %v2232_v4, -inf  ;;  %1560 = vmatpush3.bf16.msra.mxu0 %v2259_v59 }
 0x20d   :  { %1140 = vmax.xlane.f32.xlu0 %v1139_v5  ;;  %v1121_v8 = vpop.f32.mrf.mxu1  ;;  %1591 = vmatprep.subr.bf16.mxu0 %v1804_v0 }
 0x20e   :  { %v2237_v9 = vadd.f32 %v1121_v8, %v2140_v41 }
 0x20f   :  { %v1658_v11 = vpop.f32.mrf.mxu1 }
 0x210   :  { %v1142_v14 = vsel %vm478_vm13, %v2237_v9, -inf }
 0x211   :  { %1143 = vmax.xlane.f32.xlu1 %v1142_v14  ;;  %v1126_v17 = vpop.f32.mrf.mxu1 }
 0x212   :  { %v2242_v19 = vadd.f32 %v1126_v17, %v2147_v45 }
 0x213   :  { %v1661_v13 = vpop.f32.mrf.mxu1 }
 0x214   :  { %v1145_v23 = vsel %vm478_vm13, %v2242_v19, -inf }
 0x215   :  { %1146 = vmax.xlane.f32.xlu0 %v1145_v23  ;;  %v1129_v20 = vpop.f32.mrf.mxu1 }
 0x216   :  { %v2247_v24 = vadd.f32 %v1129_v20, %v2147_v45 }
 0x217   :  { %v1662_v41 = vpop.f32.mrf.mxu1 }
 0x218   :  { %v1148_v26 = vsel %vm478_vm13, %v2247_v24, -inf }
 0x219   :  { %1149 = vmax.xlane.f32.xlu1 %v1148_v26 }
 0x246   :  { %v481_v47 = vpop.xlane.xlu0 %480 }
 0x247   :  { %v497_v45 = vsub.f32 %v2119_v10, %v481_v47 }
 0x249   :  { %v503_v54 = vmul.f32 1.442695, %v497_v45 }
 0x24a   :  { %v484_v55 = vpop.xlane.xlu0 %483 }
 0x24b   :  { %1708 = vpow2.f32 %v503_v54  ;;  %v498_v58 = vsub.f32 %v2131_v35, %v484_v55 }
 0x24d   :  { %v505_v60 = vmul.f32 1.442695, %v498_v58 }
 0x24e   :  { %v487_v10 = vpop.xlane.xlu1 %486 }
 0x24f   :  { %1710 = vpow2.f32 %v505_v60  ;;  %v499_v63 = vsub.f32 %v2138_v39, %v487_v10 }
 0x251   :  { %v507_v1 = vmul.f32 1.442695, %v499_v63 }
 0x252   :  { %v490_v3 = vpop.xlane.xlu1 %489 }
 0x253   :  { %1712 = vpow2.f32 %v507_v1  ;;  %v500_v35 = vsub.f32 %v2145_v44, %v490_v3 }
 0x255   :  { %v509_v30 = vmul.f32 1.442695, %v500_v35 }
 0x256   :  { %v493_v5 = vpop.xlane.xlu0 %492 }
 0x257   :  { %1714 = vpow2.f32 %v509_v30  ;;  %v501_v8 = vsub.f32 %v2152_v49, %v493_v5 }
 0x258   :  { %v2268_v11 = vpop.eup %1708 }
 0x259   :  { %v511_v14 = vmul.f32 1.442695, %v501_v8  ;;  %v515_v39 = vsel %vm478_vm13, %v2268_v11, 0.0 }
 0x25a   :  { %v496_v17 = vpop.xlane.xlu1 %495  ;;  %516 = vadd.xlane.f32.xlu0 %v515_v39 }
 0x25b   :  { %1716 = vpow2.f32 %v511_v14  ;;  %v502_v13 = vsub.f32 %v2157_v53, %v496_v17 }
 0x25c   :  { %v2273_v23 = vpop.eup %1710 }
 0x25d   :  { %v513_v20 = vmul.f32 1.442695, %v502_v13  ;;  %v518_v44 = vsel %vm478_vm13, %v2273_v23, 0.0 }
 0x25e   :  { %v700_v41 = vpop.xlane.xlu0 %699  ;;  %519 = vadd.xlane.f32.xlu1 %v518_v44 }
 0x25f   :  { %1718 = vpow2.f32 %v513_v20  ;;  %v716_v49 = vsub.f32 %v2162_v57, %v700_v41 }
 0x260   :  { %v2278_v26 = vpop.eup %1712 }
 0x261   :  { %v722_v27 = vmul.f32 1.442695, %v716_v49  ;;  %v521_v28 = vsel %vm478_vm13, %v2278_v26, 0.0 }
 0x262   :  { %v703_v6 = vpop.xlane.xlu1 %702  ;;  %522 = vadd.xlane.f32.xlu0 %v521_v28 }
 0x263   :  { %1720 = vpow2.f32 %v722_v27  ;;  %v717_v53 = vsub.f32 %v2167_v61, %v703_v6 }
 0x264   :  { %v2283_v31 = vpop.eup %1714 }
 0x265   :  { %v724_v32 = vmul.f32 1.442695, %v717_v53  ;;  %v524_v34 = vsel %vm478_vm13, %v2283_v31, 0.0 }
 0x266   :  { %v706_v36 = vpop.xlane.xlu0 %705  ;;  %525 = vadd.xlane.f32.xlu1 %v524_v34 }
 0x267   :  { %1722 = vpow2.f32 %v724_v32  ;;  %v718_v57 = vsub.f32 %v2172_v2, %v706_v36 }
 0x268   :  { %v2288_v37 = vpop.eup %1716 }
 0x269   :  { %v726_v40 = vmul.f32 1.442695, %v718_v57  ;;  %v527_v42 = vsel %vm478_vm13, %v2288_v37, 0.0 }
 0x26a   :  { %v709_v43 = vpop.xlane.xlu1 %708  ;;  %528 = vadd.xlane.f32.xlu0 %v527_v42 }
 0x26b   :  { %1724 = vpow2.f32 %v726_v40  ;;  %v719_v61 = vsub.f32 %v2177_v7, %v709_v43 }
 0x26c   :  { %v2293_v47 = vpop.eup %1718 }
 0x26d   :  { %v728_v45 = vmul.f32 1.442695, %v719_v61  ;;  %v530_v50 = vsel %vm478_vm13, %v2293_v47, 0.0 }
 0x26e   :  { %v712_v54 = vpop.xlane.xlu0 %711  ;;  %531 = vadd.xlane.f32.xlu1 %v530_v50 }
 0x26f   :  { %1726 = vpow2.f32 %v728_v45  ;;  %v720_v2 = vsub.f32 %v2182_v12, %v712_v54 }
 0x270   :  { %v2298_v55 = vpop.eup %1720 }
 0x271   :  { %v730_v58 = vmul.f32 1.442695, %v720_v2  ;;  %v734_v60 = vsel %vm478_vm13, %v2298_v55, 0.0 }
 0x272   :  { %v715_v10 = vpop.xlane.xlu1 %714  ;;  %735 = vadd.xlane.f32.xlu0 %v734_v60 }
 0x273   :  { %1728 = vpow2.f32 %v730_v58  ;;  %v721_v7 = vsub.f32 %v2187_v22, %v715_v10 }
 0x274   :  { %v2303_v63 = vpop.eup %1722 }
 0x275   :  { %v732_v1 = vmul.f32 1.442695, %v721_v7  ;;  %v737_v3 = vsel %vm478_vm13, %v2303_v63, 0.0 }
 0x276   :  { %v918_v35 = vpop.xlane.xlu0 %917  ;;  %738 = vadd.xlane.f32.xlu1 %v737_v3 }
 0x277   :  { %1730 = vpow2.f32 %v732_v1  ;;  %v934_v12 = vsub.f32 %v2192_v25, %v918_v35 }
 0x278   :  { %v2308_v30 = vpop.eup %1724 }
 0x279   :  { %v940_v5 = vmul.f32 1.442695, %v934_v12  ;;  %v740_v8 = vsel %vm478_vm13, %v2308_v30, 0.0 }
 0x27a   :  { %v921_v14 = vpop.xlane.xlu1 %920  ;;  %741 = vadd.xlane.f32.xlu0 %v740_v8 }
 0x27b   :  { %1732 = vpow2.f32 %v940_v5  ;;  %v935_v22 = vsub.f32 %v2197_v29, %v921_v14 }
 0x27c   :  { %v2313_v39 = vpop.eup %1726 }
 0x27d   :  { %v942_v17 = vmul.f32 1.442695, %v935_v22  ;;  %v743_v13 = vsel %vm478_vm13, %v2313_v39, 0.0 }
 0x27e   :  { %v924_v20 = vpop.xlane.xlu0 %923  ;;  %744 = vadd.xlane.f32.xlu1 %v743_v13 }
 0x27f   :  { %1734 = vpow2.f32 %v942_v17  ;;  %v936_v25 = vsub.f32 %v2202_v33, %v924_v20 }
 0x280   :  { %v2318_v44 = vpop.eup %1728 }
 0x281   :  { %v944_v41 = vmul.f32 1.442695, %v936_v25  ;;  %v746_v49 = vsel %vm478_vm13, %v2318_v44, 0.0 }
 0x282   :  { %v927_v27 = vpop.xlane.xlu1 %926  ;;  %747 = vadd.xlane.f32.xlu0 %v746_v49 }
 0x283   :  { %1736 = vpow2.f32 %v944_v41  ;;  %v937_v29 = vsub.f32 %v2207_v38, %v927_v27 }
 0x284   :  { %v2323_v28 = vpop.eup %1730 }
 0x285   :  { %v946_v6 = vmul.f32 1.442695, %v937_v29  ;;  %v749_v53 = vsel %vm478_vm13, %v2323_v28, 0.0 }
 0x286   :  { %v930_v32 = vpop.xlane.xlu0 %929  ;;  %750 = vadd.xlane.f32.xlu1 %v749_v53 }
 0x287   :  { %1738 = vpow2.f32 %v946_v6  ;;  %v938_v33 = vsub.f32 %v2212_v46, %v930_v32 }
 0x288   :  { %v2328_v34 = vpop.eup %1732 }
 0x289   :  { %v948_v36 = vmul.f32 1.442695, %v938_v33  ;;  %v952_v57 = vsel %vm478_vm13, %v2328_v34, 0.0 }
 0x28a   :  { %v933_v40 = vpop.xlane.xlu1 %932  ;;  %953 = vadd.xlane.f32.xlu0 %v952_v57 }
 0x28b   :  { %1740 = vpow2.f32 %v948_v36  ;;  %v939_v38 = vsub.f32 %v2217_v51, %v933_v40 }
 0x28c   :  { %v2333_v42 = vpop.eup %1734 }
 0x28d   :  { %v950_v43 = vmul.f32 1.442695, %v939_v38  ;;  %v955_v61 = vsel %vm478_vm13, %v2333_v42, 0.0 }
 0x28e   :  { %v1135_v45 = vpop.xlane.xlu0 %1134  ;;  %956 = vadd.xlane.f32.xlu1 %v955_v61 }
 0x28f   :  { %1742 = vpow2.f32 %v950_v43  ;;  %v1151_v46 = vsub.f32 %v2222_v56, %v1135_v45 }
 0x290   :  { %v2338_v50 = vpop.eup %1736 }
 0x291   :  { %v1157_v54 = vmul.f32 1.442695, %v1151_v46  ;;  %v958_v2 = vsel %vm478_vm13, %v2338_v50, 0.0 }
 0x292   :  { %v1138_v58 = vpop.xlane.xlu1 %1137  ;;  %959 = vadd.xlane.f32.xlu0 %v958_v2 }
 0x293   :  { %1744 = vpow2.f32 %v1157_v54  ;;  %v1152_v51 = vsub.f32 %v2227_v62, %v1138_v58 }
 0x294   :  { %v2343_v60 = vpop.eup %1738 }
 0x295   :  { %v1159_v10 = vmul.f32 1.442695, %v1152_v51  ;;  %v961_v7 = vsel %vm478_vm13, %v2343_v60, 0.0 }
 0x296   :  { %v1141_v1 = vpop.xlane.xlu0 %1140  ;;  %962 = vadd.xlane.f32.xlu1 %v961_v7 }
 0x297   :  { %1746 = vpow2.f32 %v1159_v10  ;;  %v1153_v56 = vsub.f32 %v2232_v4, %v1141_v1 }
 0x298   :  { %v2348_v3 = vpop.eup %1740 }
 0x299   :  { %v1161_v35 = vmul.f32 1.442695, %v1153_v56  ;;  %v964_v12 = vsel %vm478_vm13, %v2348_v3, 0.0 }
 0x29a   :  { %v1144_v5 = vpop.xlane.xlu1 %1143  ;;  %965 = vadd.xlane.f32.xlu0 %v964_v12 }
 0x29b   :  { %1748 = vpow2.f32 %v1161_v35  ;;  %v1154_v62 = vsub.f32 %v2237_v9, %v1144_v5 }
 0x29c   :  { %v2353_v8 = vpop.eup %1742 }
 0x29d   :  { %v1163_v14 = vmul.f32 1.442695, %v1154_v62  ;;  %v967_v22 = vsel %vm478_vm13, %v2353_v8, 0.0 }
 0x29e   :  { %v1147_v17 = vpop.xlane.xlu0 %1146  ;;  %968 = vadd.xlane.f32.xlu1 %v967_v22 }
 0x29f   :  { %1750 = vpow2.f32 %v1163_v14  ;;  %v1155_v4 = vsub.f32 %v2242_v19, %v1147_v17 }
 0x2a0   :  { %v2358_v13 = vpop.eup %1744 }
 0x2a1   :  { %v1165_v20 = vmul.f32 1.442695, %v1155_v4  ;;  %v1169_v25 = vsel %vm478_vm13, %v2358_v13, 0.0 }
 0x2a2   :  { %1170 = vadd.xlane.f32.xlu0 %v1169_v25  ;;  %v1150_v41 = vpop.xlane.xlu1 %1149 }
 0x2a3   :  { %1752 = vpow2.f32 %v1165_v20  ;;  %v1156_v9 = vsub.f32 %v2247_v24, %v1150_v41 }
 0x2a4   :  { %v2363_v49 = vpop.eup %1746 }
 0x2a5   :  { %v1167_v27 = vmul.f32 1.442695, %v1156_v9  ;;  %v1172_v29 = vsel %vm478_vm13, %v2363_v49, 0.0 }
 0x2a6   :  { %1173 = vadd.xlane.f32.xlu1 %v1172_v29 }
 0x2a7   :  { %1754 = vpow2.f32 %v1167_v27 }
 0x2a8   :  { %v2367_v19 = vpop.eup %1748 }
 0x2a9   :  { %v1175_v6 = vsel %vm478_vm13, %v2367_v19, 0.0 }
 0x2aa   :  { %1176 = vadd.xlane.f32.xlu0 %v1175_v6 }
 0x2ac   :  { %v2371_v53 = vpop.eup %1750 }
 0x2ad   :  { %v1178_v32 = vsel %vm478_vm13, %v2371_v53, 0.0 }
 0x2ae   :  { %1179 = vadd.xlane.f32.xlu1 %v1178_v32 }
 0x2b0   :  { %v2375_v24 = vpop.eup %1752 }
 0x2b1   :  { %v1181_v33 = vsel %vm478_vm13, %v2375_v24, 0.0 }
 0x2b2   :  { %1182 = vadd.xlane.f32.xlu0 %v1181_v33 }
 0x2b4   :  { %v2379_v36 = vpop.eup %1754 }
 0x2b5   :  { %v1184_v57 = vsel %vm478_vm13, %v2379_v36, 0.0 }
 0x2b6   :  { %1185 = vadd.xlane.f32.xlu1 %v1184_v57 }
 0x2e3   :  { %v517_v40 = vpop.xlane.xlu0 %516 }
 0x2e4   :  { %1756 = vrcp.f32 %v517_v40 }
 0x2e7   :  { %v520_v38 = vpop.xlane.xlu1 %519 }
 0x2e8   :  { %1758 = vrcp.f32 %v520_v38 }
 0x2eb   :  { %v523_v43 = vpop.xlane.xlu0 %522 }
 0x2ec   :  { %1760 = vrcp.f32 %v523_v43 }
 0x2ef   :  { %v526_v61 = vpop.xlane.xlu1 %525 }
 0x2f0   :  { %1762 = vrcp.f32 %v526_v61 }
 0x2f1   :  { %v1757_v45 = vpop.eup %1756 }
 0x2f2   :  { %v534_v2 = vmul.f32 %v1757_v45, %v2268_v11 }
 0x2f3   :  { %v529_v46 = vpop.xlane.xlu0 %528 }
 0x2f4   :  { %1764 = vrcp.f32 %v529_v46 }
 0x2f5   :  { %v1759_v54 = vpop.eup %1758 }
 0x2f6   :  { %v536_v58 = vmul.f32 %v1759_v54, %v2273_v23 }
 0x2f7   :  { %v532_v51 = vpop.xlane.xlu1 %531 }
 0x2f8   :  { %v545_v10 = vpack.c.bf16 %v536_v58, %v534_v2  ;;  %1766 = vrcp.f32 %v532_v51 }
 0x2f9   :  { %v1761_v7 = vpop.eup %1760 }
 0x2fa   :  { %1562 = vmatmul.mubr.msk.bf16.vlgmr.msra.gmra.mxu0 %vm478_vm13, %v545_v10  ;;  %v538_v11 = vmul.f32 %v1761_v7, %v2278_v26 }
 0x2fb   :  { %1592 = vmatpush3.bf16.msra.mxu0 %v2251_v48  ;;  %v736_v1 = vpop.xlane.xlu0 %735  ;;  %1565 = vmatprep.mubr.msk.bf16.mxu0 %vm1805_vm0, %v1804_v0 }
 0x2fc   :  { %1593 = vmatprep.subr.bf16.mxu0 %v1804_v0  ;;  %1768 = vrcp.f32 %v736_v1 }
 0x2fd   :  { %v1763_v56 = vpop.eup %1762 }
 0x2fe   :  { %v540_v23 = vmul.f32 %v1763_v56, %v2283_v31 }
 0x2ff   :  { %1594 = vmatpush3.bf16.msra.mxu0 %v2254_v52  ;;  %v739_v35 = vpop.xlane.xlu1 %738 }
 0x300   :  { %1770 = vrcp.f32 %v739_v35  ;;  %1595 = vmatprep.subr.bf16.mxu0 %v1804_v0  ;;  %v546_v12 = vpack.c.bf16 %v540_v23, %v538_v11 }
 0x301   :  { %v1765_v5 = vpop.eup %1764 }
 0x302   :  { %1566 = vmatmul.mubr.msk.bf16.gmra.mxu0 %vm478_vm13, %v546_v12  ;;  %v542_v31 = vmul.f32 %v1765_v5, %v2288_v37 }
 0x303   :  { %1596 = vmatpush3.bf16.msra.mxu0 %v2259_v59  ;;  %v742_v62 = vpop.xlane.xlu0 %741  ;;  %1569 = vmatprep.mubr.msk.bf16.mxu0 %vm1805_vm0, %v1804_v0 }
 0x304   :  { %1627 = vmatprep.subr.bf16.mxu0 %v1804_v0  ;;  %1772 = vrcp.f32 %v742_v62 }
 0x305   :  { %v1767_v26 = vpop.eup %1766 }
 0x306   :  { %v544_v14 = vmul.f32 %v1767_v26, %v2293_v47 }
 0x307   :  { %v745_v22 = vpop.xlane.xlu1 %744 }
 0x308   :  { %1774 = vrcp.f32 %v745_v22  ;;  %v547_v17 = vpack.c.bf16 %v544_v14, %v542_v31 }
 0x309   :  { %v1769_v4 = vpop.eup %1768 }
 0x30a   :  { %1570 = vmatmul.mubr.msk.bf16.gmra.mxu0 %vm478_vm13, %v547_v17  ;;  %v753_v41 = vmul.f32 %v1769_v4, %v2298_v55 }
 0x30b   :  { %v748_v20 = vpop.xlane.xlu0 %747  ;;  %1597 = vmatprep.mubr.msk.bf16.mxu0 %vm1805_vm0, %v1804_v0 }
 0x30c   :  { %1776 = vrcp.f32 %v748_v20 }
 0x30d   :  { %v1771_v25 = vpop.eup %1770 }
 0x30e   :  { %v755_v9 = vmul.f32 %v1771_v25, %v2303_v63 }
 0x30f   :  { %v751_v27 = vpop.xlane.xlu1 %750 }
 0x310   :  { %v764_v37 = vpack.c.bf16 %v755_v9, %v753_v41  ;;  %1778 = vrcp.f32 %v751_v27 }
 0x311   :  { %v1773_v47 = vpop.eup %1772 }
 0x312   :  { %1598 = vmatmul.mubr.msk.bf16.vlgmr.msra.gmra.mxu0 %vm478_vm13, %v764_v37  ;;  %v757_v55 = vmul.f32 %v1773_v47, %v2308_v30 }
 0x313   :  { %1628 = vmatpush3.bf16.msra.mxu0 %v2251_v48  ;;  %v954_v29 = vpop.xlane.xlu0 %953  ;;  %1601 = vmatprep.mubr.msk.bf16.mxu0 %vm1805_vm0, %v1804_v0 }
 0x314   :  { %1629 = vmatprep.subr.bf16.mxu0 %v1804_v0  ;;  %1780 = vrcp.f32 %v954_v29 }
 0x315   :  { %v1775_v6 = vpop.eup %1774 }
 0x316   :  { %v759_v63 = vmul.f32 %v1775_v6, %v2313_v39 }
 0x317   :  { %1630 = vmatpush3.bf16.msra.mxu0 %v2254_v52  ;;  %v957_v32 = vpop.xlane.xlu1 %956 }
 0x318   :  { %1782 = vrcp.f32 %v957_v32  ;;  %1631 = vmatprep.subr.bf16.mxu0 %v1804_v0  ;;  %v765_v33 = vpack.c.bf16 %v759_v63, %v757_v55 }
 0x319   :  { %v1777_v57 = vpop.eup %1776 }
 0x31a   :  { %1602 = vmatmul.mubr.msk.bf16.gmra.mxu0 %vm478_vm13, %v765_v33  ;;  %v761_v39 = vmul.f32 %v1777_v57, %v2318_v44 }
 0x31b   :  { %1632 = vmatpush3.bf16.msra.mxu0 %v2259_v59  ;;  %v960_v40 = vpop.xlane.xlu0 %959  ;;  %1605 = vmatprep.mubr.msk.bf16.mxu0 %vm1805_vm0, %v1804_v0 }
 0x31c   :  { %1663 = vmatprep.subr.bf16.mxu0 %v1804_v0  ;;  %1784 = vrcp.f32 %v960_v40 }
 0x31d   :  { %v1779_v30 = vpop.eup %1778 }
 0x31e   :  { %v763_v38 = vmul.f32 %v1779_v30, %v2323_v28 }
 0x31f   :  { %v963_v43 = vpop.xlane.xlu1 %962 }
 0x320   :  { %1786 = vrcp.f32 %v963_v43  ;;  %v766_v61 = vpack.c.bf16 %v763_v38, %v761_v39 }
 0x321   :  { %v1781_v45 = vpop.eup %1780 }
 0x322   :  { %1606 = vmatmul.mubr.msk.bf16.gmra.mxu0 %vm478_vm13, %v766_v61  ;;  %v971_v2 = vmul.f32 %v1781_v45, %v2328_v34 }
 0x323   :  { %v966_v46 = vpop.xlane.xlu0 %965  ;;  %1633 = vmatprep.mubr.msk.bf16.mxu0 %vm1805_vm0, %v1804_v0 }
 0x324   :  { %1788 = vrcp.f32 %v966_v46 }
 0x325   :  { %v1783_v54 = vpop.eup %1782 }
 0x326   :  { %v973_v58 = vmul.f32 %v1783_v54, %v2333_v42 }
 0x327   :  { %v969_v51 = vpop.xlane.xlu1 %968 }
 0x328   :  { %v982_v44 = vpack.c.bf16 %v973_v58, %v971_v2  ;;  %1790 = vrcp.f32 %v969_v51 }
 0x329   :  { %v1785_v28 = vpop.eup %1784 }
 0x32a   :  { %1634 = vmatmul.mubr.msk.bf16.vlgmr.msra.gmra.mxu0 %vm478_vm13, %v982_v44  ;;  %v975_v34 = vmul.f32 %v1785_v28, %v2338_v50 }
 0x32b   :  { %1664 = vmatpush3.bf16.msra.mxu0 %v2251_v48  ;;  %v1171_v10 = vpop.xlane.xlu0 %1170  ;;  %1637 = vmatprep.mubr.msk.bf16.mxu0 %vm1805_vm0, %v1804_v0 }
 0x32c   :  { %1665 = vmatprep.subr.bf16.mxu0 %v1804_v0  ;;  %1792 = vrcp.f32 %v1171_v10 }
 0x32d   :  { %v1787_v7 = vpop.eup %1786 }
 0x32e   :  { %v977_v42 = vmul.f32 %v1787_v7, %v2343_v60 }
 0x32f   :  { %1666 = vmatpush3.bf16.msra.mxu0 %v2254_v52  ;;  %v1174_v1 = vpop.xlane.xlu1 %1173 }
 0x330   :  { %1794 = vrcp.f32 %v1174_v1  ;;  %1667 = vmatprep.subr.bf16.mxu0 %v1804_v0  ;;  %v983_v56 = vpack.c.bf16 %v977_v42, %v975_v34 }
 0x331   :  { %v1789_v48 = vpop.eup %1788 }
 0x332   :  { %1638 = vmatmul.mubr.msk.bf16.gmra.mxu0 %vm478_vm13, %v983_v56  ;;  %v979_v50 = vmul.f32 %v1789_v48, %v2348_v3 }
 0x333   :  { %1668 = vmatpush3.bf16.msra.mxu0 %v2259_v59  ;;  %v1177_v11 = vpop.xlane.xlu0 %1176  ;;  %1641 = vmatprep.mubr.msk.bf16.mxu0 %vm1805_vm0, %v1804_v0 }
 0x334   :  { %1796 = vrcp.f32 %v1177_v11 }
 0x335   :  { %v1791_v23 = vpop.eup %1790 }
 0x336   :  { %v981_v52 = vmul.f32 %v1791_v23, %v2353_v8 }
 0x337   :  { %v1180_v60 = vpop.xlane.xlu1 %1179 }
 0x338   :  { %1798 = vrcp.f32 %v1180_v60  ;;  %v984_v35 = vpack.c.bf16 %v981_v52, %v979_v50 }
 0x339   :  { %v1793_v12 = vpop.eup %1792 }
 0x33a   :  { %1642 = vmatmul.mubr.msk.bf16.gmra.mxu0 %vm478_vm13, %v984_v35  ;;  %v1188_v62 = vmul.f32 %v1793_v12, %v2358_v13 }
 0x33b   :  { %v1183_v5 = vpop.xlane.xlu0 %1182  ;;  %1669 = vmatprep.mubr.msk.bf16.mxu0 %vm1805_vm0, %v1804_v0 }
 0x33c   :  { %1800 = vrcp.f32 %v1183_v5 }
 0x33d   :  { %v1795_v59 = vpop.eup %1794 }
 0x33e   :  { %v1190_v26 = vmul.f32 %v1795_v59, %v2363_v49 }
 0x33f   :  { %v1186_v31 = vpop.xlane.xlu1 %1185 }
 0x340   :  { %v1199_v3 = vpack.c.bf16 %v1190_v26, %v1188_v62  ;;  %1802 = vrcp.f32 %v1186_v31 }
 0x341   :  { %v1797_v8 = vpop.eup %1796 }
 0x342   :  { %1670 = vmatmul.mubr.msk.bf16.vlgmr.msra.gmra.mxu0 %vm478_vm13, %v1199_v3  ;;  %v1192_v22 = vmul.f32 %v1797_v8, %v2367_v19  ;;  %v1706_v19 = vld [vmem:[%s2551_s4 + $0x8] sm:$0xff]  }
 0x343   :  { %1673 = vmatprep.mubr.msk.bf16.mxu0 %vm1805_vm0, %v1804_v0  ;;  %1682 = vmatpush3.bf16.msra.mxu1 %v1706_v19 }
 0x344   :  { %1683 = vmatprep.subr.bf16.mxu1 %v1804_v0 }
 0x345   :  { %v1799_v14 = vpop.eup %1798 }
 0x346   :  { %v1194_v17 = vmul.f32 %v1799_v14, %v2371_v53  ;;  %v1707_v53 = vld [vmem:[%s2551_s4] sm:$0xff]  }
 0x347   :  { %1684 = vmatpush3.bf16.msra.mxu1 %v1707_v53 }
 0x348   :  { %v1200_v4 = vpack.c.bf16 %v1194_v17, %v1192_v22 }
 0x349   :  { %v1801_v13 = vpop.eup %1800 }
 0x34a   :  { %1674 = vmatmul.mubr.msk.bf16.gmra.mxu0 %vm478_vm13, %v1200_v4  ;;  %v1196_v20 = vmul.f32 %v1801_v13, %v2375_v24 }
 0x34b   :  { %1677 = vmatprep.mubr.msk.bf16.mxu0 %vm1805_vm0, %v1804_v0 }
 0x34d   :  { %v1803_v49 = vpop.eup %1802 }
 0x34e   :  { %v1198_v25 = vmul.f32 %v1803_v49, %v2379_v36 }
 0x350   :  { %v1201_v41 = vpack.c.bf16 %v1198_v25, %v1196_v20 }
 0x352   :  { %1678 = vmatmul.mubr.msk.bf16.gmra.mxu0 %vm478_vm13, %v1201_v41 }
 0x3ba   :  { %v591_v9 = vpop.f32.mrf.mxu0 }
 0x3bb   :  { %v614_v52 = vsel %vm316_vm8, %v591_v9, 0.0 }
 0x3bc   :  { %v1563_v27 = vpop.f32.mrf.mxu0 }
 0x3be   :  { %v594_v24 = vpop.f32.mrf.mxu0 }
 0x3bf   :  { %v615_v60 = vsel %vm316_vm8, %v594_v24, 0.0 }
 0x3c0   :  { %v1564_v37 = vpop.f32.mrf.mxu0 }
 0x3c2   :  { %v599_v36 = vpop.f32.mrf.mxu0 }
 0x3c3   :  { %v616_v17 = vsel %vm316_vm8, %v599_v36, 0.0 }
 0x3c4   :  { %v1567_v47 = vpop.f32.mrf.mxu0 }
 0x3c6   :  { %v602_v29 = vpop.f32.mrf.mxu0 }
 0x3c7   :  { %v617_v4 = vsel %vm316_vm8, %v602_v29, 0.0 }
 0x3c8   :  { %v1568_v6 = vpop.f32.mrf.mxu0 }
 0x3ca   :  { %v607_v55 = vpop.f32.mrf.mxu0 }
 0x3cb   :  { %v618_v36 = vsel %vm316_vm8, %v607_v55, 0.0 }
 0x3cc   :  { %v1571_v63 = vpop.f32.mrf.mxu0 }
 0x3ce   :  { %v610_v32 = vpop.f32.mrf.mxu0 }
 0x3cf   :  { %v619_v47 = vsel %vm316_vm8, %v610_v32, 0.0 }
 0x3d0   :  { %v1572_v33 = vpop.f32.mrf.mxu0 }
 0x3d2   :  { %v810_v57 = vpop.f32.mrf.mxu0 }
 0x3d3   :  { %v833_v12 = vsel %vm2026_vm11, %v810_v57, %v614_v52 }
 0x3d4   :  { %v1599_v40 = vpop.f32.mrf.mxu0 }
 0x3d6   :  { %v813_v30 = vpop.f32.mrf.mxu0 }
 0x3d7   :  { %v834_v5 = vsel %vm2026_vm11, %v813_v30, %v615_v60 }
 0x3d8   :  { %v1600_v39 = vpop.f32.mrf.mxu0 }
 0x3da   :  { %v818_v38 = vpop.f32.mrf.mxu0 }
 0x3db   :  { %v835_v49 = vsel %vm2026_vm11, %v818_v38, %v616_v17 }
 0x3dc   :  { %v1603_v43 = vpop.f32.mrf.mxu0 }
 0x3de   :  { %v821_v61 = vpop.f32.mrf.mxu0 }
 0x3df   :  { %v836_v20 = vsel %vm2026_vm11, %v821_v61, %v617_v4 }
 0x3e0   :  { %v1604_v45 = vpop.f32.mrf.mxu0 }
 0x3e2   :  { %v826_v46 = vpop.f32.mrf.mxu0 }
 0x3e3   :  { %v837_v6 = vsel %vm2026_vm11, %v826_v46, %v618_v36 }
 0x3e4   :  { %v1607_v54 = vpop.f32.mrf.mxu0 }
 0x3e6   :  { %v829_v2 = vpop.f32.mrf.mxu0 }
 0x3e7   :  { %v838_v63 = vsel %vm2026_vm11, %v829_v2, %v619_v47 }
 0x3e8   :  { %v1608_v58 = vpop.f32.mrf.mxu0 }
 0x3ea   :  { %v1028_v51 = vpop.f32.mrf.mxu0 }
 0x3eb   :  { %v1051_v59 = vsel %vm1930_vm7, %v1028_v51, %v833_v12 }
 0x3ec   :  { %v1635_v44 = vpop.f32.mrf.mxu0 }
 0x3ee   :  { %v1031_v28 = vpop.f32.mrf.mxu0 }
 0x3ef   :  { %v1052_v62 = vsel %vm1930_vm7, %v1031_v28, %v834_v5 }
 0x3f0   :  { %v1636_v10 = vpop.f32.mrf.mxu0 }
 0x3f2   :  { %v1036_v7 = vpop.f32.mrf.mxu0 }
 0x3f3   :  { %v1053_v25 = vsel %vm1930_vm7, %v1036_v7, %v835_v49 }
 0x3f4   :  { %v1639_v34 = vpop.f32.mrf.mxu0 }
 0x3f6   :  { %v1039_v42 = vpop.f32.mrf.mxu0 }
 0x3f7   :  { %v1054_v41 = vsel %vm1930_vm7, %v1039_v42, %v836_v20 }
 0x3f8   :  { %v1640_v1 = vpop.f32.mrf.mxu0 }
 0x3fa   :  { %v1044_v56 = vpop.f32.mrf.mxu0 }
 0x3fb   :  { %v1055_v33 = vsel %vm1930_vm7, %v1044_v56, %v837_v6 }
 0x3fc   :  { %v1643_v48 = vpop.f32.mrf.mxu0 }
 0x3fe   :  { %v1047_v11 = vpop.f32.mrf.mxu0 }
 0x3ff   :  { %v1056_v57 = vsel %vm1930_vm7, %v1047_v11, %v838_v63 }
 0x400   :  { %v1644_v23 = vpop.f32.mrf.mxu0 }
 0x402   :  { %v1245_v50 = vpop.f32.mrf.mxu0 }
 0x403   :  { %v1268_v31 = vsel %vm1922_vm6, %v1245_v50, %v1051_v59 }
 0x404   :  { %v1671_v35 = vpop.f32.mrf.mxu0 }
 0x406   :  { %v1248_v26 = vpop.f32.mrf.mxu0 }
 0x407   :  { %v1269_v3 = vsel %vm1922_vm6, %v1248_v26, %v1052_v62 }
 0x408   :  { %v1274_v8 = vpack.c.bf16 %v1269_v3, %v1268_v31  ;;  %v1672_v14 = vpop.f32.mrf.mxu0 }
 0x40a   :  { %v1253_v22 = vpop.f32.mrf.mxu0  ;;  %1686 = vmatmul.mubr.msk.bf16.vlgmr.msra.gmra.mxu1 %vm49_vm1, %v1274_v8 }
 0x40b   :  { %1689 = vmatprep.mubr.msk.bf16.mxu1 %vm1805_vm0, %v1804_v0  ;;  %v1270_v53 = vsel %vm1922_vm6, %v1253_v22, %v1053_v25 }
 0x40c   :  { %v1675_v13 = vpop.f32.mrf.mxu0 }
 0x40e   :  { %v1256_v19 = vpop.f32.mrf.mxu0 }
 0x40f   :  { %v1271_v9 = vsel %vm1922_vm6, %v1256_v19, %v1054_v41 }
 0x410   :  { %v1275_v27 = vpack.c.bf16 %v1271_v9, %v1270_v53  ;;  %v1676_v24 = vpop.f32.mrf.mxu0 }
 0x412   :  { %v1261_v37 = vpop.f32.mrf.mxu0  ;;  %1690 = vmatmul.mubr.msk.bf16.gmra.mxu1 %vm49_vm1, %v1275_v27 }
 0x413   :  { %1693 = vmatprep.mubr.msk.bf16.mxu1 %vm1805_vm0, %v1804_v0  ;;  %v1272_v55 = vsel %vm1922_vm6, %v1261_v37, %v1055_v33 }
 0x414   :  { %v1679_v29 = vpop.f32.mrf.mxu0 }
 0x416   :  { %v1264_v0 = vpop.f32.mrf.mxu0 }
 0x417   :  { %v1273_v15 = vsel %vm1922_vm6, %v1264_v0, %v1056_v57 }
 0x418   :  { %v1276_v32 = vpack.c.bf16 %v1273_v15, %v1272_v55  ;;  %v1680_v40 = vpop.f32.mrf.mxu0 }
 0x41a   :  { %1694 = vmatmul.mubr.msk.bf16.gmra.mxu1 %vm49_vm1, %v1276_v32 }
 0x4ca   :  { %v1343_v30 = vpop.f32.mrf.mxu1 }
 0x4cb   :  { %v1344_v39 = vadd.f32 %v1415_v16, %v1343_v30 }
 0x4cc   :  { %v1687_v38 = vpop.f32.mrf.mxu1 }
 0x4cd   :  { %1366 = vst.msk [vmem:[%s2553_s6] sm:$0xff] %vm49_vm1, %v1344_v39 }
 0x4ce   :  { %v1346_v21 = vpop.f32.mrf.mxu1 }
 0x4cf   :  { %v1347_v43 = vadd.f32 %v1415_v16, %v1346_v21 }
 0x4d0   :  { %v1688_v18 = vpop.f32.mrf.mxu1 }
 0x4d1   :  { %1367 = vst.msk [vmem:[%s2553_s6 + $0x8] sm:$0xff] %vm49_vm1, %v1347_v43 }
 0x4d2   :  { %v1351_v61 = vpop.f32.mrf.mxu1 }
 0x4d3   :  { %v1352_v45 = vadd.f32 %v1415_v16, %v1351_v61 }
 0x4d4   :  { %v1691_v46 = vpop.f32.mrf.mxu1 }
 0x4d5   :  { %1368 = vst.msk [vmem:[%s2553_s6 + $0x10] sm:$0xff] %vm49_vm1, %v1352_v45 }
 0x4d6   :  { %v1354_v54 = vpop.f32.mrf.mxu1 }
 0x4d7   :  { %v1355_v2 = vadd.f32 %v1415_v16, %v1354_v54 }
 0x4d8   :  { %v1692_v58 = vpop.f32.mrf.mxu1 }
 0x4d9   :  { %1369 = vst.msk [vmem:[%s2553_s6 + $0x18] sm:$0xff] %vm49_vm1, %v1355_v2 }
 0x4da   :  { %v1359_v51 = vpop.f32.mrf.mxu1 }
 0x4db   :  { %v1360_v44 = vadd.f32 %v1415_v16, %v1359_v51 }
 0x4dc   :  { %v1695_v28 = vpop.f32.mrf.mxu1 }
 0x4dd   :  { %1370 = vst.msk [vmem:[%s2553_s6 + $0x20] sm:$0xff] %vm49_vm1, %v1360_v44 }
 0x4de   :  { %v1362_v10 = vpop.f32.mrf.mxu1 }
 0x4df   :  { %v1363_v7 = vadd.f32 %v1415_v16, %v1362_v10 }
 0x4e0   :  { %v1696_v34 = vpop.f32.mrf.mxu1 }
 0x4e1   :  { %1371 = vst.msk [vmem:[%s2553_s6 + $0x28] sm:$0xff] %vm49_vm1, %v1363_v7 }

</bundles_post_ra>
